<compile_context>
chip_gen: v7x
topology: tpu7x:2x2x1
jax: 0.10.0
libtpu: 0.0.40
codegen_flags: <defaults>
</compile_context>

<pallas_src>
import jax
import jax.numpy as jnp
from jax.experimental import pallas as pl
from jax.experimental.pallas import tpu as pltpu

_LANE = 128


def _round_up(n, m):
    return ((n + m - 1) // m) * m


def _choose_block_rows(B, block_rows):
    """Batch-tile size: multiple of 128, capped by block_rows, and sized so the
    grid has >= 2 steps whenever B > 128 (v7x megacore sharding)."""
    cap = max(_LANE, (block_rows // _LANE) * _LANE)
    if B <= _LANE:
        return _LANE                     # tiny batch: one small tile
    half = _round_up(-(-B // 2), _LANE)  # ceil(B/2) rounded up to 128
    return min(cap, half)


def _mlp_kernel(x_ref, w1_ref, b1_ref, w2_ref, b2_ref, w3_ref, b3_ref,
                w4_ref, b4_ref, o_ref):
    """One batch tile: (bt, D) f32 -> (bt, 1) f32. All 4 layers fused in VMEM."""
    # dense1 + relu : f32 x cast to bf16 in-kernel (MXU-native), f32 accumulate.
    xb = x_ref[...].astype(jnp.bfloat16)
    h = jnp.dot(xb, w1_ref[...], preferred_element_type=jnp.float32)
    h = jnp.maximum(h + b1_ref[...], 0.0)
    # dropout1: identity at inference
    # dense2 + relu : (bt, 128) @ (128, 256)
    h = jnp.dot(h.astype(jnp.bfloat16), w2_ref[...],
                preferred_element_type=jnp.float32)
    h = jnp.maximum(h + b2_ref[...], 0.0)
    # dropout2: identity at inference
    # dense3 + relu : (bt, 256) @ (256, 128)
    h = jnp.dot(h.astype(jnp.bfloat16), w3_ref[...],
                preferred_element_type=jnp.float32)
    h = jnp.maximum(h + b3_ref[...], 0.0)
    # output layer (128 -> 1): VPU multiply + XLU lane-reduce.  An N=1 MXU
    # matmul would occupy the MXU for as many cycles as the 128x256 layer
    # while producing 1/256 of the useful output.
    o_ref[...] = jnp.sum(h * w4_ref[...], axis=-1, keepdims=True) + b4_ref[...]


def nba_points_forward(x, params, *, block_rows=2048):
    """x: (B, D) float32.  params: w1..w3 (in,out) bf16, w4 (1,128) f32,
    b1..b3 (1,out) f32, b4 (1,1) f32.  Returns (B, 1) float32."""
    B, D = x.shape
    w1, b1 = params["w1"], params["b1"]
    w2, b2 = params["w2"], params["b2"]
    w3, b3 = params["w3"], params["b3"]
    w4, b4 = params["w4"], params["b4"]

    bt = _choose_block_rows(B, block_rows)
    B_pad = _round_up(B, bt)
    if B_pad != B:
        # Pad rows produce garbage (bias+ReLU on zeros) that is sliced off
        # below; nothing in the kernel reduces over the batch axis.
        x = jnp.pad(x, ((0, B_pad - B), (0, 0)))

    grid = (B_pad // bt,)

    def _full(a):                          # constant index_map -> VMEM-resident
        return pl.BlockSpec(a.shape, lambda i: (0,) * a.ndim)

    in_specs = [
        pl.BlockSpec((bt, D), lambda i: (i, 0)),   # x: streamed / pipelined, f32
        _full(w1), _full(b1),
        _full(w2), _full(b2),
        _full(w3), _full(b3),
        _full(w4), _full(b4),
    ]
    out_spec = pl.BlockSpec((bt, 1), lambda i: (i, 0))

    out = pl.pallas_call(
        _mlp_kernel,
        out_shape=jax.ShapeDtypeStruct((B_pad, 1), jnp.float32),
        grid_spec=pltpu.PrefetchScalarGridSpec(
            num_scalar_prefetch=0,
            grid=grid,
            in_specs=in_specs,
            out_specs=out_spec,
        ),
        compiler_params=pltpu.CompilerParams(
            dimension_semantics=("parallel",),     # 2-TC sharding on v7x
            vmem_limit_bytes=32 * 1024 * 1024,     # real footprint << 32 MiB
        ),
    )(x, w1, b1, w2, b2, w3, b3, w4, b4)

    return out[:B]


def init_params(key, input_dim):
    """Matches the PyTorch layer shapes. Matmul weights stored (in, out) in bf16
    (MXU-native); final layer stored as a (1, 128) f32 row (== torch output.weight);
    biases (1, out) f32."""
    dims = [(input_dim, 128), (128, 256), (256, 128), (128, 1)]
    params = {}
    for i, (fan_in, fan_out) in enumerate(dims, start=1):
        key, kw, kb = jax.random.split(key, 3)
        bound = 1.0 / jnp.sqrt(jnp.float32(fan_in))
        w = jax.random.uniform(kw, (fan_in, fan_out), jnp.float32, -bound, bound)
        b = jax.random.uniform(kb, (1, fan_out), jnp.float32, -bound, bound)
        if i < 4:
            params[f"w{i}"] = w.astype(jnp.bfloat16)
            params[f"b{i}"] = b
        else:
            params["w4"] = w.T              # (1, 128) f32 row for the VPU multiply
            params["b4"] = b                # (1, 1) f32
    return params


def reference_forward(x, params):
    """Pure-JAX reference mimicking the kernel numerics (bf16 matmul operands,
    f32 accumulation, f32 bias/ReLU, eval-mode dropout = identity).
    NOTE: bf16 operands imply ~1e-2-level drift vs the original f32 torch model."""
    f32, bf16 = jnp.float32, jnp.bfloat16
    h = jnp.dot(x.astype(bf16), params["w1"], preferred_element_type=f32)
    h = jnp.maximum(h + params["b1"], 0.0)
    h = jnp.dot(h.astype(bf16), params["w2"], preferred_element_type=f32)
    h = jnp.maximum(h + params["b2"], 0.0)
    h = jnp.dot(h.astype(bf16), params["w3"], preferred_element_type=f32)
    h = jnp.maximum(h + params["b3"], 0.0)
    return jnp.sum(h * params["w4"], axis=-1, keepdims=True) + params["b4"]


if __name__ == "__main__":
    key = jax.random.PRNGKey(0)
    kx, kp = jax.random.split(key)

    # Non-multiple batch: exercises padding, a 2-step pipelined grid, and the
    # v7x both-TensorCores path (bt = 256, B_pad = 512, grid = (2,)).
    B, INPUT_DIM = 500, 32
    x = jax.random.normal(kx, (B, INPUT_DIM), dtype=jnp.float32)
    params = init_params(kp, INPUT_DIM)

    out = nba_points_forward(x, params)
    out = jax.block_until_ready(out)

    ref = reference_forward(x, params)
    assert out.shape == (B, 1)
    assert jnp.allclose(out, ref, atol=1e-2, rtol=1e-2), \
        float(jnp.max(jnp.abs(out - ref)))

    print("KERNEL_OK")
</pallas_src>

<mosaic_0001>
module attributes {stable_mosaic.version = 11 : i64} {
  func.func @_mlp_kernel(%arg0: i32, %arg1: memref<256x32xf32, #tpu.memory_space<vmem>>, %arg2: memref<32x128xbf16, #tpu.memory_space<vmem>>, %arg3: memref<1x128xf32, #tpu.memory_space<vmem>>, %arg4: memref<128x256xbf16, #tpu.memory_space<vmem>>, %arg5: memref<1x256xf32, #tpu.memory_space<vmem>>, %arg6: memref<256x128xbf16, #tpu.memory_space<vmem>>, %arg7: memref<1x128xf32, #tpu.memory_space<vmem>>, %arg8: memref<1x128xf32, #tpu.memory_space<vmem>>, %arg9: memref<1x1xf32, #tpu.memory_space<vmem>>, %arg10: memref<256x1xf32, #tpu.memory_space<vmem>>) attributes {dimension_semantics = [#tpu.dimension_semantics<parallel>], iteration_bounds = array<i64: 2>, scalar_prefetch = 0 : i64, scratch_operands = 0 : i64, tpu.core_type = #tpu.core_type<tc>, window_params = [{transform_indices = @transform_0, window_bounds = array<i64: 256, 32>}, {pipeline_mode = #tpu.pipeline_mode<synchronous>, transform_indices = @transform_1, window_bounds = array<i64: 32, 128>}, {pipeline_mode = #tpu.pipeline_mode<synchronous>, transform_indices = @transform_2, window_bounds = array<i64: 1, 128>}, {pipeline_mode = #tpu.pipeline_mode<synchronous>, transform_indices = @transform_3, window_bounds = array<i64: 128, 256>}, {pipeline_mode = #tpu.pipeline_mode<synchronous>, transform_indices = @transform_4, window_bounds = array<i64: 1, 256>}, {pipeline_mode = #tpu.pipeline_mode<synchronous>, transform_indices = @transform_5, window_bounds = array<i64: 256, 128>}, {pipeline_mode = #tpu.pipeline_mode<synchronous>, transform_indices = @transform_6, window_bounds = array<i64: 1, 128>}, {pipeline_mode = #tpu.pipeline_mode<synchronous>, transform_indices = @transform_7, window_bounds = array<i64: 1, 128>}, {pipeline_mode = #tpu.pipeline_mode<synchronous>, transform_indices = @transform_8, window_bounds = array<i64: 1, 1>}, {transform_indices = @transform_9, window_bounds = array<i64: 256, 1>}]} {
    %c0 = arith.constant 0 : index
    %c0_0 = arith.constant 0 : index
    %0 = vector.load %arg1[%c0, %c0_0] : memref<256x32xf32, #tpu.memory_space<vmem>>, vector<256x32xf32>
    %1 = arith.truncf %0 : vector<256x32xf32> to vector<256x32xbf16>
    %c0_1 = arith.constant 0 : index
    %c0_2 = arith.constant 0 : index
    %2 = vector.load %arg2[%c0_1, %c0_2] : memref<32x128xbf16, #tpu.memory_space<vmem>>, vector<32x128xbf16>
    %cst = arith.constant dense<0.000000e+00> : vector<256x128xf32>
    %3 = tpu.matmul %1, %2, %cst {dimension_numbers = #tpu.dot_dimension_numbers<[1], [0], [0], [1], [0, 0, 1, 1], [], []>} : vector<256x32xbf16>, vector<32x128xbf16>, vector<256x128xf32> -> vector<256x128xf32>
    %c0_3 = arith.constant 0 : index
    %c0_4 = arith.constant 0 : index
    %4 = vector.load %arg3[%c0_3, %c0_4] : memref<1x128xf32, #tpu.memory_space<vmem>>, vector<1x128xf32>
    %5 = vector.broadcast %4 : vector<1x128xf32> to vector<256x128xf32>
    %6 = arith.addf %3, %5 : vector<256x128xf32>
    %cst_5 = arith.constant 0.000000e+00 : f32
    %7 = vector.broadcast %cst_5 : f32 to vector<256x128xf32>
    %8 = arith.maximumf %6, %7 : vector<256x128xf32>
    %9 = arith.truncf %8 : vector<256x128xf32> to vector<256x128xbf16>
    %c0_6 = arith.constant 0 : index
    %c0_7 = arith.constant 0 : index
    %10 = vector.load %arg4[%c0_6, %c0_7] : memref<128x256xbf16, #tpu.memory_space<vmem>>, vector<128x256xbf16>
    %cst_8 = arith.constant dense<0.000000e+00> : vector<256x256xf32>
    %11 = tpu.matmul %9, %10, %cst_8 {dimension_numbers = #tpu.dot_dimension_numbers<[1], [0], [0], [1], [0, 0, 1, 1], [], []>} : vector<256x128xbf16>, vector<128x256xbf16>, vector<256x256xf32> -> vector<256x256xf32>
    %c0_9 = arith.constant 0 : index
    %c0_10 = arith.constant 0 : index
    %12 = vector.load %arg5[%c0_9, %c0_10] : memref<1x256xf32, #tpu.memory_space<vmem>>, vector<1x256xf32>
    %13 = vector.broadcast %12 : vector<1x256xf32> to vector<256x256xf32>
    %14 = arith.addf %11, %13 : vector<256x256xf32>
    %cst_11 = arith.constant 0.000000e+00 : f32
    %15 = vector.broadcast %cst_11 : f32 to vector<256x256xf32>
    %16 = arith.maximumf %14, %15 : vector<256x256xf32>
    %17 = arith.truncf %16 : vector<256x256xf32> to vector<256x256xbf16>
    %c0_12 = arith.constant 0 : index
    %c0_13 = arith.constant 0 : index
    %18 = vector.load %arg6[%c0_12, %c0_13] : memref<256x128xbf16, #tpu.memory_space<vmem>>, vector<256x128xbf16>
    %cst_14 = arith.constant dense<0.000000e+00> : vector<256x128xf32>
    %19 = tpu.matmul %17, %18, %cst_14 {dimension_numbers = #tpu.dot_dimension_numbers<[1], [0], [0], [1], [0, 0, 1, 1], [], []>} : vector<256x256xbf16>, vector<256x128xbf16>, vector<256x128xf32> -> vector<256x128xf32>
    %c0_15 = arith.constant 0 : index
    %c0_16 = arith.constant 0 : index
    %20 = vector.load %arg7[%c0_15, %c0_16] : memref<1x128xf32, #tpu.memory_space<vmem>>, vector<1x128xf32>
    %21 = vector.broadcast %20 : vector<1x128xf32> to vector<256x128xf32>
    %22 = arith.addf %19, %21 : vector<256x128xf32>
    %cst_17 = arith.constant 0.000000e+00 : f32
    %23 = vector.broadcast %cst_17 : f32 to vector<256x128xf32>
    %24 = arith.maximumf %22, %23 : vector<256x128xf32>
    %c0_18 = arith.constant 0 : index
    %c0_19 = arith.constant 0 : index
    %25 = vector.load %arg8[%c0_18, %c0_19] : memref<1x128xf32, #tpu.memory_space<vmem>>, vector<1x128xf32>
    %26 = vector.broadcast %25 : vector<1x128xf32> to vector<256x128xf32>
    %27 = arith.mulf %24, %26 : vector<256x128xf32>
    %cst_20 = arith.constant dense<0.000000e+00> : vector<256xf32>
    %28 = vector.multi_reduction <add>, %27, %cst_20 [1] : vector<256x128xf32> to vector<256xf32>
    %29 = vector.shape_cast %28 : vector<256xf32> to vector<256x1xf32>
    %c0_21 = arith.constant 0 : index
    %c0_22 = arith.constant 0 : index
    %30 = vector.load %arg9[%c0_21, %c0_22] : memref<1x1xf32, #tpu.memory_space<vmem>>, vector<1x1xf32>
    %31 = vector.broadcast %30 : vector<1x1xf32> to vector<256x1xf32>
    %32 = arith.addf %29, %31 : vector<256x1xf32>
    %c0_23 = arith.constant 0 : index
    %c0_24 = arith.constant 0 : index
    %33 = vector.load %arg10[%c0_23, %c0_24] : memref<256x1xf32, #tpu.memory_space<vmem>>, vector<256x1xf32>
    tpu.vector_store %arg10[%c0_23, %c0_24], %32 {strides = array<i32>} : memref<256x1xf32, #tpu.memory_space<vmem>>, vector<256x1xf32>,
    return
  }
  func.func @transform_0(%arg0: i32) -> (i32, i32) {
    %c0_i32 = arith.constant 0 : i32
    %c0_i32_0 = arith.constant 0 : i32
    return %arg0, %c0_i32 : i32, i32
  }
  func.func @transform_1(%arg0: i32) -> (i32, i32) {
    %c0_i32 = arith.constant 0 : i32
    %c0_i32_0 = arith.constant 0 : i32
    %c0_i32_1 = arith.constant 0 : i32
    return %c0_i32, %c0_i32_0 : i32, i32
  }
  func.func @transform_2(%arg0: i32) -> (i32, i32) {
    %c0_i32 = arith.constant 0 : i32
    %c0_i32_0 = arith.constant 0 : i32
    %c0_i32_1 = arith.constant 0 : i32
    return %c0_i32, %c0_i32_0 : i32, i32
  }
  func.func @transform_3(%arg0: i32) -> (i32, i32) {
    %c0_i32 = arith.constant 0 : i32
    %c0_i32_0 = arith.constant 0 : i32
    %c0_i32_1 = arith.constant 0 : i32
    return %c0_i32, %c0_i32_0 : i32, i32
  }
  func.func @transform_4(%arg0: i32) -> (i32, i32) {
    %c0_i32 = arith.constant 0 : i32
    %c0_i32_0 = arith.constant 0 : i32
    %c0_i32_1 = arith.constant 0 : i32
    return %c0_i32, %c0_i32_0 : i32, i32
  }
  func.func @transform_5(%arg0: i32) -> (i32, i32) {
    %c0_i32 = arith.constant 0 : i32
    %c0_i32_0 = arith.constant 0 : i32
    %c0_i32_1 = arith.constant 0 : i32
    return %c0_i32, %c0_i32_0 : i32, i32
  }
  func.func @transform_6(%arg0: i32) -> (i32, i32) {
    %c0_i32 = arith.constant 0 : i32
    %c0_i32_0 = arith.constant 0 : i32
    %c0_i32_1 = arith.constant 0 : i32
    return %c0_i32, %c0_i32_0 : i32, i32
  }
  func.func @transform_7(%arg0: i32) -> (i32, i32) {
    %c0_i32 = arith.constant 0 : i32
    %c0_i32_0 = arith.constant 0 : i32
    %c0_i32_1 = arith.constant 0 : i32
    return %c0_i32, %c0_i32_0 : i32, i32
  }
  func.func @transform_8(%arg0: i32) -> (i32, i32) {
    %c0_i32 = arith.constant 0 : i32
    %c0_i32_0 = arith.constant 0 : i32
    %c0_i32_1 = arith.constant 0 : i32
    return %c0_i32, %c0_i32_0 : i32, i32
  }
  func.func @transform_9(%arg0: i32) -> (i32, i32) {
    %c0_i32 = arith.constant 0 : i32
    %c0_i32_0 = arith.constant 0 : i32
    return %arg0, %c0_i32 : i32, i32
  }
}

</mosaic_0001>

<bundles_post_ra>
// kernel: tpu_custom_call.1
= control target key start
LH: loop header
LB: loop body
LE: loop exit
PB: predicated region body
PF: predicated region fallthrough
CT: control target
= control target key end

     0   :  { %s1972_s11 = smov 0   ;;  %s2461_s0 = inlined_call_operand.vmem [shape: f32[512,32], index: 0, kind: input, shape index: {}]   ;;  %s2462_s1 = inlined_call_operand.vmem [shape: bf16[32,128], index: 1, kind: input, shape index: {}]   ;;  %s2463_s2 = inlined_call_operand.vmem [shape: f32[1,128], index: 2, kind: input, shape index: {}]   ;;  %s2464_s3 = inlined_call_operand.vmem [shape: bf16[128,256], index: 3, kind: input, shape index: {}]   ;;  %s2465_s4 = inlined_call_operand.vmem [shape: f32[1,256], index: 4, kind: input, shape index: {}]   ;;  %s2466_s5 = inlined_call_operand.vmem [shape: bf16[256,128], index: 5, kind: input, shape index: {}]   ;;  %s2467_s6 = inlined_call_operand.vmem [shape: f32[1,128], index: 6, kind: input, shape index: {}]   ;;  %s2468_s7 = inlined_call_operand.vmem [shape: f32[1,128], index: 7, kind: input, shape index: {}]   ;;  %s2469_s8 = inlined_call_operand.<no memory space> [shape: f32[1,1], index: 8, kind: input, shape index: {}]   ;;  %s2470_s9 = inlined_call_operand.vmem [shape: f32[512,1], index: 9, kind: output, shape index: {}]  }
   0x1   :  { %v14_v0 = vstv %s2469_s8 }
   0x2   :  { %15 = vst [vmem:[#allocation2] sm:$0x1] %v14_v0 }
   0x3 LB: > { %s1624_s12 = sadd.s32 4294967295, %s1916_s11   ;;  %p1628_p0 = scmp.ge.s32.totalorder %s1916_s11, 1  ;;  %s1916_s11 = sphi %s1972_s11, %s21_s11  }
   0x4   : > { %p290_p1 = scmp.lt.s32.totalorder %s1916_s11, 3 }
   0x6   : > { %p291_p2 = pnand %p1628_p0, %p290_p1 }
   0x7   : > { %v1868_v1 = vld [vmem:[%s2462_s1] sm:$0xff] (!%p291_p2)   ;;  %s1629_s8 = sshll.u32 (!%p291_p2), %s1624_s12, 5  ;;  %v1869_v2 = vld [vmem:[%s2462_s1 + $0x8] sm:$0xff] (!%p291_p2)   ;;  %vm410_vm0 = vcmask (!%p291_p2), 261120   ;;  %v1875_v26 = vld [vmem:[%s2464_s3 + $0x14] ss:$8 sps:$4 sm:$0xff] (!%p291_p2)  }
   0x8   : > { %294 = sbr.rel (%p291_p2) target bundleno = 953 (0x3b9), region = 56  ;;  %p327_p3 = scmp.lt.s32.totalorder (!%p291_p2), %s1629_s8, 63  ;;  %1819 = vmatprep.subr.bf16.mxu0 (!%p291_p2), %v1868_v1  ;;  %1855 = vmatprep.subr.bf16.mxu1 (!%p291_p2), %v1868_v1  ;;  %v1872_v3 = vld [vmem:[%s2464_s3 + $0x4] ss:$8 sps:$4 sm:$0xff] (!%p291_p2)   ;;  %v1870_v16 = vld [vmem:[%s2464_s3] ss:$8 sps:$4 sm:$0xff] (!%p291_p2)  }
   0x9   : > { %1820 = vmatpush3.bf16.msra.mxu0 (!%p291_p2), %v1868_v1  ;;  %1857 = vmatpush3.bf16.msra.mxu1 (!%p291_p2), %v1868_v1  ;;  %v1873_v30 = vld [vmem:[%s2464_s3 + $0x10] ss:$8 sps:$4 sm:$0xff] (!%p291_p2)   ;;  %v1878_v31 = vld [vmem:[%s2464_s3 + $0x24] ss:$8 sps:$4 sm:$0xff] (!%p291_p2)   ;;  %v1876_v39 = vld [vmem:[%s2464_s3 + $0x20] ss:$8 sps:$4 sm:$0xff] (!%p291_p2)  }
   0xa   : > { %1821 = vmatprep.subr.bf16.mxu0 (!%p291_p2), %v1869_v2  ;;  %1856 = vmatprep.subr.bf16.mxu1 (!%p291_p2), %v1869_v2  ;;  %v1881_v42 = vld [vmem:[%s2464_s3 + $0x34] ss:$8 sps:$4 sm:$0xff] (!%p291_p2)   ;;  %v1879_v47 = vld [vmem:[%s2464_s3 + $0x30] ss:$8 sps:$4 sm:$0xff] (!%p291_p2)   ;;  %v1884_v51 = vld [vmem:[%s2464_s3 + $0x44] ss:$8 sps:$4 sm:$0xff] (!%p291_p2)  }
   0xb   : > { %v1882_v54 = vld [vmem:[%s2464_s3 + $0x40] ss:$8 sps:$4 sm:$0xff] (!%p291_p2)   ;;  %v1887_v56 = vld [vmem:[%s2464_s3 + $0x54] ss:$8 sps:$4 sm:$0xff] (!%p291_p2)   ;;  %v1885_v61 = vld [vmem:[%s2464_s3 + $0x50] ss:$8 sps:$4 sm:$0xff] (!%p291_p2)  }
   0xc   : > { %v1890_v63 = vld [vmem:[%s2464_s3 + $0x64] ss:$8 sps:$4 sm:$0xff] (!%p291_p2)   ;;  %v1888_v0 = vld [vmem:[%s2464_s3 + $0x60] ss:$8 sps:$4 sm:$0xff] (!%p291_p2)   ;;  %v1893_v1 = vld [vmem:[%s2464_s3 + $0x74] ss:$8 sps:$4 sm:$0xff] (!%p291_p2)  }
   0xd   : > { %1822 = vmatpush3.bf16.msra.mxu0 (!%p291_p2), %v1869_v2  ;;  %1858 = vmatpush3.bf16.msra.mxu1 (!%p291_p2), %v1869_v2  ;;  %v1891_v2 = vld [vmem:[%s2464_s3 + $0x70] ss:$8 sps:$4 sm:$0xff] (!%p291_p2)   ;;  %vm1535_vm1 = vcmask (!%p291_p2), 7168  }
   0xe   : > { %776 = vmatprep.subr.bf16.mxu1 (!%p291_p2), %v1872_v3  ;;  %v1918_v3 = vmov (!%p291_p2), 0  }
   0xf   : > { %s2472_s8 = smov (!%p327_p3, %s1629_s8), 63 }
  0x10   : > { %s1630_s19 = sshll.u32 %s2472_s8, 3 }
  0x11   : > { %s1997_s22 = scalar_lea.vmem %s2461_s0, %s1630_s19  ;;  %s2360_s18 = scalar_lea.vmem %s2470_s9, %s1630_s19 }
  0x12   : > { %v339_v4 = vld [vmem:[%s1997_s22] sm:$0xff]  ;;  %v340_v5 = vld [vmem:[%s1997_s22 + $0x8] sm:$0xff]  ;;  %v341_v6 = vld [vmem:[%s1997_s22 + $0x10] sm:$0xff] }
  0x13   : > { %v371_v7 = vpack.c.bf16 %v340_v5, %v339_v4  ;;  %v342_v8 = vld [vmem:[%s1997_s22 + $0x18] sm:$0xff]  ;;  %v343_v9 = vld [vmem:[%s1997_s22 + $0x20] sm:$0xff]  ;;  %v344_v10 = vld [vmem:[%s1997_s22 + $0x28] sm:$0xff] }
  0x14   : > { %v372_v11 = vpack.c.bf16 %v342_v8, %v341_v6  ;;  %v373_v12 = vpack.c.bf16 %v344_v10, %v343_v9  ;;  %v345_v13 = vld [vmem:[%s1997_s22 + $0x30] sm:$0xff]  ;;  %v346_v14 = vld [vmem:[%s1997_s22 + $0x38] sm:$0xff]  ;;  %v347_v15 = vld [vmem:[%s1997_s22 + $0x40] sm:$0xff] }
  0x15   : > { %1823 = vmatprep.mubr.msk.bf16.mxu0 %vm410_vm0, %v371_v7  ;;  %v348_v17 = vld [vmem:[%s1997_s22 + $0x48] sm:$0xff]  ;;  %v355_v18 = vld [vmem:[%s1997_s22 + $0x80] sm:$0xff]  ;;  %v357_v21 = vld [vmem:[%s1997_s22 + $0x90] sm:$0xff]  ;;  %v374_v27 = vpack.c.bf16 %v346_v14, %v345_v13 }
  0x16   : > { %1824 = vmatmul.mubr.msk.bf16.vlgmr.msra.gmra.mrb[0].mxu0 %vm410_vm0, %v372_v11  ;;  %v356_v19 = vld [vmem:[%s1997_s22 + $0x88] sm:$0xff]  ;;  %v358_v22 = vld [vmem:[%s1997_s22 + $0x98] sm:$0xff]  ;;  %v359_v23 = vld [vmem:[%s1997_s22 + $0xa0] sm:$0xff]  ;;  %v375_v29 = vpack.c.bf16 %v348_v17, %v347_v15 }
  0x17   : > { %1827 = vmatprep.mubr.msk.bf16.mxu0 %vm410_vm0, %v373_v12  ;;  %v379_v20 = vpack.c.bf16 %v356_v19, %v355_v18  ;;  %v380_v24 = vpack.c.bf16 %v358_v22, %v357_v21  ;;  %v360_v25 = vld [vmem:[%s1997_s22 + $0xa8] sm:$0xff]  ;;  %v361_v32 = vld [vmem:[%s1997_s22 + $0xb0] sm:$0xff]  ;;  %v362_v33 = vld [vmem:[%s1997_s22 + $0xb8] sm:$0xff] }
  0x18   : > { %v381_v28 = vpack.c.bf16 %v360_v25, %v359_v23  ;;  %v363_v34 = vld [vmem:[%s1997_s22 + $0xc0] sm:$0xff]  ;;  %v349_v35 = vld [vmem:[%s1997_s22 + $0x50] sm:$0xff]  ;;  %v350_v36 = vld [vmem:[%s1997_s22 + $0x58] sm:$0xff]  ;;  %v382_v41 = vpack.c.bf16 %v362_v33, %v361_v32 }
  0x19   : > { %1839 = vmatprep.mubr.msk.bf16.mxu1 %vm410_vm0, %v379_v20  ;;  %v364_v37 = vld [vmem:[%s1997_s22 + $0xc8] sm:$0xff]  ;;  %v351_v38 = vld [vmem:[%s1997_s22 + $0x60] sm:$0xff]  ;;  %v376_v44 = vpack.c.bf16 %v350_v36, %v349_v35  ;;  %v365_v45 = vld [vmem:[%s1997_s22 + $0xd0] sm:$0xff] }
  0x1a   : > { %1840 = vmatmul.mubr.msk.bf16.vlgmr.msra.gmra.mrb[0].mxu1 %vm410_vm0, %v380_v24  ;;  %v352_v40 = vld [vmem:[%s1997_s22 + $0x68] sm:$0xff]  ;;  %v383_v43 = vpack.c.bf16 %v364_v37, %v363_v34  ;;  %v366_v46 = vld [vmem:[%s1997_s22 + $0xd8] sm:$0xff]  ;;  %v367_v49 = vld [vmem:[%s1997_s22 + $0xe0] sm:$0xff] }
  0x1b   : > { %1843 = vmatprep.mubr.msk.bf16.mxu1 %vm410_vm0, %v381_v28  ;;  %777 = vmatpush1.bf16.msra.mxu1 %v1870_v16  ;;  %v377_v48 = vpack.c.bf16 %v352_v40, %v351_v38  ;;  %v368_v50 = vld [vmem:[%s1997_s22 + $0xe8] sm:$0xff]  ;;  %v353_v52 = vld [vmem:[%s1997_s22 + $0x70] sm:$0xff]  ;;  %v354_v53 = vld [vmem:[%s1997_s22 + $0x78] sm:$0xff]  ;;  %v384_v55 = vpack.c.bf16 %v366_v46, %v365_v45 }
  0x1c   : > { %778 = vmatprep.subr.bf16.mxu1 %v1875_v26  ;;  %v385_v57 = vpack.c.bf16 %v368_v50, %v367_v49  ;;  %v378_v58 = vpack.c.bf16 %v354_v53, %v353_v52  ;;  %v369_v59 = vld [vmem:[%s1997_s22 + $0xf0] sm:$0xff]  ;;  %v370_v60 = vld [vmem:[%s1997_s22 + $0xf8] sm:$0xff]  ;;  %v2096_v4 = vld [vmem:[%s2463_s2] ss:$0 sm:$0xff] }
  0x1d   : > { %v386_v62 = vpack.c.bf16 %v370_v60, %v369_v59  ;;  %v1894_v10 = vld [vmem:[%s2466_s5 + $0x40] sm:$0xff]   ;;  %v1896_v12 = vld [vmem:[%s2466_s5 + $0x48] sm:$0xff]   ;;  %v1898_v24 = vld [vmem:[%s2466_s5 + $0x50] sm:$0xff]  }
  0x1e   : > { %1828 = vmatmul.mubr.msk.bf16.gmra.mrb[4].mxu0 %vm410_vm0, %v374_v27  ;;  %v1895_v11 = vld [vmem:[%s2466_s5] sm:$0xff]   ;;  %1707 = vmatprep.subr.bf16.mxu0 %v1894_v10  ;;  %v1897_v19 = vld [vmem:[%s2466_s5 + $0x8] sm:$0xff]   ;;  %v1899_v37 = vld [vmem:[%s2466_s5 + $0x10] sm:$0xff]  }
  0x1f   : > { %1831 = vmatprep.mubr.msk.bf16.mxu0 %vm410_vm0, %v375_v29  ;;  %779 = vmatpush1.bf16.msra.mxu1 %v1873_v30  ;;  %v1901_v52 = vld [vmem:[%s2466_s5 + $0x18] sm:$0xff]  }
  0x20   : > { %780 = vmatprep.subr.bf16.mxu1 %v1878_v31  ;;  %1708 = vmatpush3.bf16.msra.mxu0 %v1895_v11  ;;  %v1904_v11 = vld [vmem:[%s2466_s5 + $0x68] sm:$0xff]  }
  0x21   : > { %1709 = vmatprep.subr.bf16.mxu0 %v1896_v12 }
  0x22   : > { %1844 = vmatmul.mubr.msk.bf16.gmra.mrb[4].mxu1 %vm410_vm0, %v382_v41  ;;  %v1900_v41 = vld [vmem:[%s2466_s5 + $0x58] sm:$0xff]  }
  0x23   : > { %1847 = vmatprep.mubr.msk.bf16.mxu1 %vm410_vm0, %v383_v43  ;;  %781 = vmatpush1.bf16.msra.mxu1 %v1876_v39 }
  0x24   : > { %782 = vmatprep.subr.bf16.mxu1 %v1881_v42  ;;  %1710 = vmatpush3.bf16.msra.mxu0 %v1897_v19 }
  0x25   : > { %1711 = vmatprep.subr.bf16.mxu0 %v1898_v24 }
  0x26   : > { %1832 = vmatmul.mubr.msk.bf16.gmra.mrb[8].mxu0 %vm410_vm0, %v376_v44 }
  0x27   : > { %1835 = vmatprep.mubr.msk.bf16.mxu0 %vm410_vm0, %v377_v48  ;;  %783 = vmatpush1.bf16.msra.mxu1 %v1879_v47 }
  0x28   : > { %784 = vmatprep.subr.bf16.mxu1 %v1884_v51  ;;  %1712 = vmatpush3.bf16.msra.mxu0 %v1899_v37 }
  0x29   : > { %1713 = vmatprep.subr.bf16.mxu0 %v1900_v41 }
  0x2a   : > { %1848 = vmatmul.mubr.msk.bf16.gmra.mrb[8].mxu1 %vm410_vm0, %v384_v55 }
  0x2b   : > { %1851 = vmatprep.mubr.msk.bf16.mxu1 %vm410_vm0, %v385_v57  ;;  %785 = vmatpush1.bf16.msra.mxu1 %v1882_v54 }
  0x2c   : > { %786 = vmatprep.subr.bf16.mxu1 %v1887_v56  ;;  %v1902_v56 = vld [vmem:[%s2466_s5 + $0x60] sm:$0xff]   ;;  %1714 = vmatpush3.bf16.msra.mxu0 %v1901_v52 }
  0x2d   : > { %1715 = vmatprep.subr.bf16.mxu0 %v1902_v56 }
  0x2e   : > { %1836 = vmatmul.mubr.msk.bf16.gmra.mrb[12].mxu0 %vm410_vm0, %v378_v58 }
  0x2f   : > { %787 = vmatpush1.bf16.msra.mxu1 %v1885_v61 }
  0x30   : > { %788 = vmatprep.subr.bf16.mxu1 %v1890_v63 }
  0x32   : > { %1852 = vmatmul.mubr.msk.bf16.gmra.mrb[12].mxu1 %vm410_vm0, %v386_v62 }
  0x33   : > { %789 = vmatpush1.bf16.msra.mxu1 %v1888_v0  ;;  %808 = vmatprep.mubr.bf16.mxu1 %v1918_v3 }
  0x34   : > { %790 = vmatprep.subr.bf16.mxu1 %v1893_v1 }
  0x37   : > { %791 = vmatpush1.bf16.msra.mxu1 %v1891_v2 }
  0xe9   : > { %v1825_v5 = vpop.f32.mrb[0].mxu0 }
  0xea   : > { %v502_v6 = vadd.f32 %v1825_v5, %v2096_v4  ;;  %v493_v7 = vpop.f32.mrb[1].mxu0 }
  0xeb   : > { %v494_v8 = vadd.f32 %v2096_v4, %v493_v7  ;;  %v1826_v9 = vpop.f32.mrb[2].mxu0  ;;  %v1903_v7 = vld [vmem:[%s2466_s5 + $0x20] sm:$0xff]  }
  0xec   : > { %v505_v13 = vadd.f32 %v1826_v9, %v2096_v4  ;;  %v496_v14 = vpop.f32.mrb[3].mxu0  ;;  %v622_v16 = vmax.f32 %v502_v6, 0.0  ;;  %1716 = vmatpush3.bf16.msra.mxu0 %v1903_v7 }
  0xed   : > { %v497_v15 = vadd.f32 %v2096_v4, %v496_v14  ;;  %v1841_v18 = vpop.f32.mrb[0].mxu1  ;;  %v620_v20 = vmax.f32 %v494_v8, 0.0  ;;  %1717 = vmatprep.subr.bf16.mxu0 %v1904_v11  ;;  %v684_v11 = vld [vmem:[%s2465_s4] sm:$0x3] }
  0xee   : > { %v623_v17 = vmax.f32 %v505_v13, 0.0  ;;  %v566_v22 = vadd.f32 %v1841_v18, %v2096_v4  ;;  %v557_v23 = vpop.f32.mrb[1].mxu1 }
  0xef   : > { %v621_v21 = vmax.f32 %v497_v15, 0.0  ;;  %v558_v26 = vadd.f32 %v2096_v4, %v557_v23  ;;  %v1842_v27 = vpop.f32.mrb[2].mxu1 }
  0xf0   : > { %v653_v25 = vpack.c.bf16 %v623_v17, %v622_v16  ;;  %v638_v30 = vmax.f32 %v566_v22, 0.0  ;;  %v569_v31 = vadd.f32 %v1842_v27, %v2096_v4  ;;  %v560_v32 = vpop.f32.mrb[3].mxu1  ;;  %v1905_v22 = vld [vmem:[%s2466_s5 + $0x28] sm:$0xff]  }
  0xf1   : > { %v652_v28 = vpack.c.bf16 %v621_v21, %v620_v20  ;;  %v1829_v29 = vpop.f32.mrb[4].mxu0  ;;  %v636_v35 = vmax.f32 %v558_v26, 0.0  ;;  %v561_v36 = vadd.f32 %v2096_v4, %v560_v32  ;;  %1718 = vmatpush3.bf16.msra.mxu0 %v1905_v22 }
  0xf2   : > { %v518_v33 = vadd.f32 %v1829_v29, %v2096_v4  ;;  %v509_v34 = vpop.f32.mrb[5].mxu0  ;;  %v639_v40 = vmax.f32 %v569_v31, 0.0 }
  0xf3   : > { %809 = vmatmul.mubr.bf16.vlgmr.msra.gmra.mrb[16].mxu1 %v652_v28  ;;  %v510_v38 = vadd.f32 %v2096_v4, %v509_v34  ;;  %v1830_v39 = vpop.f32.mrb[6].mxu0  ;;  %v637_v45 = vmax.f32 %v561_v36, 0.0 }
  0xf4   : > { %v626_v42 = vmax.f32 %v518_v33, 0.0  ;;  %v521_v43 = vadd.f32 %v1830_v39, %v2096_v4  ;;  %v512_v44 = vpop.f32.mrb[7].mxu0  ;;  %818 = vmatprep.mubr.bf16.mxu1 %v1918_v3  ;;  %v2132_v48 = vpack.c.bf16 %v639_v40, %v638_v30 }
  0xf5   : > { %v624_v46 = vmax.f32 %v510_v38, 0.0  ;;  %v513_v47 = vadd.f32 %v2096_v4, %v512_v44  ;;  %v2134_v50 = vpack.c.bf16 %v637_v45, %v636_v35  ;;  %v1845_v51 = vpop.f32.mrb[4].mxu1 }
  0xf6   : > { %v627_v49 = vmax.f32 %v521_v43, 0.0  ;;  %v582_v54 = vadd.f32 %v1845_v51, %v2096_v4  ;;  %v573_v55 = vpop.f32.mrb[5].mxu1 }
  0xf7   : > { %v625_v53 = vmax.f32 %v513_v47, 0.0  ;;  %v574_v58 = vadd.f32 %v2096_v4, %v573_v55  ;;  %v1846_v59 = vpop.f32.mrb[6].mxu1 }
  0xf8   : > { %v2143_v57 = vpack.c.bf16 %v627_v49, %v626_v42  ;;  %v642_v62 = vmax.f32 %v582_v54, 0.0  ;;  %v585_v63 = vadd.f32 %v1846_v59, %v2096_v4  ;;  %v576_v0 = vpop.f32.mrb[7].mxu1 }
  0xf9   : > { %v654_v60 = vpack.c.bf16 %v625_v53, %v624_v46  ;;  %v1833_v61 = vpop.f32.mrb[8].mxu0  ;;  %v640_v5 = vmax.f32 %v574_v58, 0.0  ;;  %v577_v6 = vadd.f32 %v2096_v4, %v576_v0 }
  0xfa   : > { %v534_v1 = vadd.f32 %v1833_v61, %v2096_v4  ;;  %v525_v2 = vpop.f32.mrb[9].mxu0  ;;  %v643_v10 = vmax.f32 %v585_v63, 0.0 }
  0xfb   : > { %819 = vmatmul.mubr.bf16.gmra.mrb[20].mxu1 %v653_v25  ;;  %v526_v8 = vadd.f32 %v2096_v4, %v525_v2  ;;  %v1834_v9 = vpop.f32.mrb[10].mxu0  ;;  %v641_v15 = vmax.f32 %v577_v6, 0.0 }
  0xfc   : > { %828 = vmatprep.mubr.bf16.mxu1 %v1918_v3  ;;  %v630_v12 = vmax.f32 %v534_v1, 0.0  ;;  %v537_v13 = vadd.f32 %v1834_v9, %v2096_v4  ;;  %v528_v14 = vpop.f32.mrb[11].mxu0  ;;  %v2159_v18 = vpack.c.bf16 %v643_v10, %v642_v62 }
  0xfd   : > { %v628_v16 = vmax.f32 %v526_v8, 0.0  ;;  %v529_v17 = vadd.f32 %v2096_v4, %v528_v14  ;;  %v2161_v20 = vpack.c.bf16 %v641_v15, %v640_v5  ;;  %v1849_v21 = vpop.f32.mrb[8].mxu1  ;;  %v686_v8 = vlaneseq }
  0xfe   : > { %v631_v19 = vmax.f32 %v537_v13, 0.0  ;;  %v598_v24 = vadd.f32 %v1849_v21, %v2096_v4  ;;  %v589_v25 = vpop.f32.mrb[9].mxu1 }
  0xff   : > { %v629_v23 = vmax.f32 %v529_v17, 0.0  ;;  %v590_v27 = vadd.f32 %v2096_v4, %v589_v25  ;;  %v1850_v28 = vpop.f32.mrb[10].mxu1  ;;  %v687_v9 = vshrl.u32 %v686_v8, 7 }
 0x100   : > { %v657_v26 = vpack.c.bf16 %v631_v19, %v630_v12  ;;  %v646_v31 = vmax.f32 %v598_v24, 0.0  ;;  %v601_v32 = vadd.f32 %v1850_v28, %v2096_v4  ;;  %v592_v33 = vpop.f32.mrb[11].mxu1 }
 0x101   : > { %v656_v29 = vpack.c.bf16 %v629_v23, %v628_v16  ;;  %v1837_v30 = vpop.f32.mrb[12].mxu0  ;;  %v644_v36 = vmax.f32 %v590_v27, 0.0  ;;  %v593_v37 = vadd.f32 %v2096_v4, %v592_v33  ;;  %v688_v10 = vsub.s32 0, %v687_v9 }
 0x102   : > { %v550_v34 = vadd.f32 %v1837_v30, %v2096_v4  ;;  %v541_v35 = vpop.f32.mrb[13].mxu0  ;;  %v647_v40 = vmax.f32 %v601_v32, 0.0  ;;  %v692_v12 = vsub.s32 1, %v687_v9 }
 0x103   : > { %829 = vmatmul.mubr.bf16.gmra.mrb[24].mxu1 %v654_v60  ;;  %v542_v38 = vadd.f32 %v2096_v4, %v541_v35  ;;  %v1838_v39 = vpop.f32.mrb[14].mxu0  ;;  %v645_v44 = vmax.f32 %v593_v37, 0.0  ;;  %v2211_v13 = vrot.slane %v684_v11, %v688_v10 }
 0x104   : > { %838 = vmatprep.mubr.bf16.mxu1 %v1918_v3  ;;  %v634_v41 = vmax.f32 %v550_v34, 0.0  ;;  %v553_v42 = vadd.f32 %v1838_v39, %v2096_v4  ;;  %v544_v43 = vpop.f32.mrb[15].mxu0  ;;  %v665_v47 = vpack.c.bf16 %v647_v40, %v646_v31  ;;  %v2213_v14 = vrot.slane %v684_v11, %v692_v12 }
 0x105   : > { %v632_v45 = vmax.f32 %v542_v38, 0.0  ;;  %v545_v46 = vadd.f32 %v2096_v4, %v544_v43  ;;  %v664_v51 = vpack.c.bf16 %v645_v44, %v644_v36  ;;  %v1853_v52 = vpop.f32.mrb[12].mxu1 }
 0x106   : > { %v635_v49 = vmax.f32 %v553_v42, 0.0  ;;  %v614_v54 = vadd.f32 %v1853_v52, %v2096_v4  ;;  %v605_v55 = vpop.f32.mrb[13].mxu1 }
 0x107   : > { %v633_v53 = vmax.f32 %v545_v46, 0.0  ;;  %v606_v58 = vadd.f32 %v2096_v4, %v605_v55  ;;  %v1854_v59 = vpop.f32.mrb[14].mxu1 }
 0x108   : > { %v659_v56 = vpack.c.bf16 %v635_v49, %v634_v41  ;;  %v650_v61 = vmax.f32 %v614_v54, 0.0  ;;  %v617_v62 = vadd.f32 %v1854_v59, %v2096_v4  ;;  %v608_v63 = vpop.f32.mrb[15].mxu1 }
 0x109   : > { %v658_v60 = vpack.c.bf16 %v633_v53, %v632_v45  ;;  %v648_v0 = vmax.f32 %v606_v58, 0.0  ;;  %v609_v1 = vadd.f32 %v2096_v4, %v608_v63  ;;  %v1906_v4 = vld [vmem:[%s2466_s5 + $0x70] sm:$0xff]  }
 0x10a   : > { %v651_v2 = vmax.f32 %v617_v62, 0.0  ;;  %1719 = vmatprep.subr.bf16.mxu0 %v1906_v4 }
 0x10b   : > { %839 = vmatmul.mubr.bf16.gmra.mrb[28].mxu1 %v2143_v57  ;;  %v649_v5 = vmax.f32 %v609_v1, 0.0  ;;  %v1907_v57 = vld [vmem:[%s2466_s5 + $0x30] sm:$0xff]  }
 0x10c   : > { %848 = vmatprep.mubr.bf16.mxu1 %v1918_v3  ;;  %v667_v6 = vpack.c.bf16 %v651_v2, %v650_v61  ;;  %1720 = vmatpush3.bf16.msra.mxu0 %v1907_v57 }
 0x10d   : > { %v666_v7 = vpack.c.bf16 %v649_v5, %v648_v0 }
 0x113   : > { %849 = vmatmul.mubr.bf16.gmra.mrb[32].mxu1 %v656_v29 }
 0x114   : > { %858 = vmatprep.mubr.bf16.mxu1 %v1918_v3 }
 0x11b   : > { %859 = vmatmul.mubr.bf16.gmra.mrb[36].mxu1 %v657_v26 }
 0x11c   : > { %868 = vmatprep.mubr.bf16.mxu1 %v1918_v3 }
 0x123   : > { %869 = vmatmul.mubr.bf16.gmra.mrb[40].mxu1 %v658_v60 }
 0x124   : > { %878 = vmatprep.mubr.bf16.mxu1 %v1918_v3 }
 0x12b   : > { %879 = vmatmul.mubr.bf16.gmra.mrb[44].mxu1 %v659_v56 }
 0x12c   : > { %888 = vmatprep.mubr.bf16.mxu1 %v1918_v3 }
 0x133   : > { %889 = vmatmul.mubr.bf16.gmra.mrb[48].mxu1 %v2134_v50  ;;  %v1909_v50 = vld [vmem:[%s2466_s5 + $0x38] sm:$0xff]  }
 0x134   : > { %898 = vmatprep.mubr.bf16.mxu1 %v1918_v3 }
 0x13b   : > { %899 = vmatmul.mubr.bf16.gmra.mrb[52].mxu1 %v2132_v48  ;;  %v1908_v48 = vld [vmem:[%s2466_s5 + $0x78] sm:$0xff]  }
 0x13c   : > { %908 = vmatprep.mubr.bf16.mxu1 %v1918_v3  ;;  %1721 = vmatprep.subr.bf16.mxu0 %v1908_v48 }
 0x13d   : > { %1722 = vmatpush3.bf16.msra.mxu0 %v1909_v50 }
 0x143   : > { %909 = vmatmul.mubr.bf16.gmra.mrb[56].mxu1 %v2161_v20 }
 0x144   : > { %918 = vmatprep.mubr.bf16.mxu1 %v1918_v3 }
 0x14b   : > { %919 = vmatmul.mubr.bf16.gmra.mrb[60].mxu1 %v2159_v18 }
 0x14c   : > { %928 = vmatprep.mubr.bf16.mxu1 %v1918_v3 }
 0x153   : > { %929 = vmatmul.mubr.bf16.gmra.mrb[64].mxu1 %v664_v51 }
 0x154   : > { %938 = vmatprep.mubr.bf16.mxu1 %v1918_v3 }
 0x15b   : > { %939 = vmatmul.mubr.bf16.gmra.mrb[68].mxu1 %v665_v47 }
 0x15c   : > { %948 = vmatprep.mubr.bf16.mxu1 %v1918_v3 }
 0x163   : > { %949 = vmatmul.mubr.bf16.gmra.mrb[72].mxu1 %v666_v7 }
 0x164   : > { %958 = vmatprep.mubr.bf16.mxu1 %v1918_v3 }
 0x16b   : > { %959 = vmatmul.mubr.bf16.gmra.mrb[76].mxu1 %v667_v6 }
 0x1c6   : > { %v810_v15 = vpop.f32.mrb[16].mxu1 }
 0x1c7   : > { %v811_v16 = vadd.f32 %v810_v15, %v2211_v13  ;;  %v812_v17 = vpop.f32.mrb[17].mxu1 }
 0x1c8   : > { %v813_v18 = vadd.f32 %v812_v17, %v2213_v14  ;;  %v814_v3 = vpop.f32.mrb[18].mxu1 }
 0x1c9   : > { %v815_v19 = vadd.f32 %v814_v3, %v2211_v13  ;;  %v816_v20 = vpop.f32.mrb[19].mxu1  ;;  %v969_v22 = vmax.f32 %v811_v16, 0.0 }
 0x1ca   : > { %v817_v21 = vadd.f32 %v816_v20, %v2213_v14  ;;  %v970_v24 = vmax.f32 %v813_v18, 0.0 }
 0x1cb   : > { %v971_v23 = vmax.f32 %v815_v19, 0.0 }
 0x1cc   : > { %v972_v25 = vmax.f32 %v817_v21, 0.0 }
 0x1cd   : > { %v1033_v26 = vpack.c.bf16 %v971_v23, %v969_v22 }
 0x1ce   : > { %v1034_v27 = vpack.c.bf16 %v972_v25, %v970_v24  ;;  %v820_v28 = vpop.f32.mrb[20].mxu1 }
 0x1cf   : > { %v821_v29 = vadd.f32 %v820_v28, %v2211_v13  ;;  %v822_v30 = vpop.f32.mrb[21].mxu1 }
 0x1d0   : > { %v823_v31 = vadd.f32 %v822_v30, %v2213_v14  ;;  %v824_v32 = vpop.f32.mrb[22].mxu1  ;;  %1232 = vmatprep.mubr.bf16.mxu0 %v1034_v27 }
 0x1d1   : > { %v825_v33 = vadd.f32 %v824_v32, %v2211_v13  ;;  %v826_v34 = vpop.f32.mrb[23].mxu1  ;;  %1233 = vmatmul.mubr.bf16.vlgmr.msra.gmra.mrb[16].mxu0 %v1033_v26  ;;  %v973_v36 = vmax.f32 %v821_v29, 0.0 }
 0x1d2   : > { %v827_v35 = vadd.f32 %v826_v34, %v2213_v14  ;;  %v974_v38 = vmax.f32 %v823_v31, 0.0 }
 0x1d3   : > { %v975_v37 = vmax.f32 %v825_v33, 0.0 }
 0x1d4   : > { %v976_v39 = vmax.f32 %v827_v35, 0.0 }
 0x1d5   : > { %v1035_v40 = vpack.c.bf16 %v975_v37, %v973_v36 }
 0x1d6   : > { %v1036_v41 = vpack.c.bf16 %v976_v39, %v974_v38  ;;  %v830_v42 = vpop.f32.mrb[24].mxu1 }
 0x1d7   : > { %v831_v43 = vadd.f32 %v830_v42, %v2211_v13  ;;  %v832_v44 = vpop.f32.mrb[25].mxu1 }
 0x1d8   : > { %v833_v45 = vadd.f32 %v832_v44, %v2213_v14  ;;  %v834_v46 = vpop.f32.mrb[26].mxu1  ;;  %1240 = vmatprep.mubr.bf16.mxu0 %v1036_v41 }
 0x1d9   : > { %v835_v47 = vadd.f32 %v834_v46, %v2211_v13  ;;  %v836_v49 = vpop.f32.mrb[27].mxu1  ;;  %1241 = vmatmul.mubr.bf16.gmra.mrb[20].mxu0 %v1035_v40  ;;  %v977_v52 = vmax.f32 %v831_v43, 0.0 }
 0x1da   : > { %v837_v51 = vadd.f32 %v836_v49, %v2213_v14  ;;  %v978_v54 = vmax.f32 %v833_v45, 0.0 }
 0x1db   : > { %v979_v53 = vmax.f32 %v835_v47, 0.0 }
 0x1dc   : > { %v980_v55 = vmax.f32 %v837_v51, 0.0 }
 0x1dd   : > { %v1037_v56 = vpack.c.bf16 %v979_v53, %v977_v52 }
 0x1de   : > { %v1038_v58 = vpack.c.bf16 %v980_v55, %v978_v54  ;;  %v840_v59 = vpop.f32.mrb[28].mxu1 }
 0x1df   : > { %v841_v60 = vadd.f32 %v840_v59, %v2211_v13  ;;  %v842_v61 = vpop.f32.mrb[29].mxu1 }
 0x1e0   : > { %v843_v62 = vadd.f32 %v842_v61, %v2213_v14  ;;  %v844_v63 = vpop.f32.mrb[30].mxu1  ;;  %1248 = vmatprep.mubr.bf16.mxu0 %v1038_v58 }
 0x1e1   : > { %v845_v0 = vadd.f32 %v844_v63, %v2211_v13  ;;  %v846_v1 = vpop.f32.mrb[31].mxu1  ;;  %1249 = vmatmul.mubr.bf16.gmra.mrb[24].mxu0 %v1037_v56  ;;  %v981_v5 = vmax.f32 %v841_v60, 0.0 }
 0x1e2   : > { %v847_v2 = vadd.f32 %v846_v1, %v2213_v14  ;;  %v982_v7 = vmax.f32 %v843_v62, 0.0 }
 0x1e3   : > { %v983_v6 = vmax.f32 %v845_v0, 0.0 }
 0x1e4   : > { %v984_v4 = vmax.f32 %v847_v2, 0.0 }
 0x1e5   : > { %v1039_v57 = vpack.c.bf16 %v983_v6, %v981_v5 }
 0x1e6   : > { %v1040_v48 = vpack.c.bf16 %v984_v4, %v982_v7  ;;  %v850_v50 = vpop.f32.mrb[32].mxu1 }
 0x1e7   : > { %v851_v8 = vadd.f32 %v850_v50, %v2211_v13  ;;  %v852_v9 = vpop.f32.mrb[33].mxu1 }
 0x1e8   : > { %v853_v10 = vadd.f32 %v852_v9, %v2213_v14  ;;  %v854_v11 = vpop.f32.mrb[34].mxu1  ;;  %1256 = vmatprep.mubr.bf16.mxu0 %v1040_v48 }
 0x1e9   : > { %v855_v12 = vadd.f32 %v854_v11, %v2211_v13  ;;  %v856_v15 = vpop.f32.mrb[35].mxu1  ;;  %1257 = vmatmul.mubr.bf16.gmra.mrb[28].mxu0 %v1039_v57  ;;  %v985_v17 = vmax.f32 %v851_v8, 0.0 }
 0x1ea   : > { %v857_v16 = vadd.f32 %v856_v15, %v2213_v14  ;;  %v986_v3 = vmax.f32 %v853_v10, 0.0 }
 0x1eb   : > { %v987_v18 = vmax.f32 %v855_v12, 0.0 }
 0x1ec   : > { %v988_v19 = vmax.f32 %v857_v16, 0.0 }
 0x1ed   : > { %v1041_v20 = vpack.c.bf16 %v987_v18, %v985_v17 }
 0x1ee   : > { %v1042_v21 = vpack.c.bf16 %v988_v19, %v986_v3  ;;  %v860_v22 = vpop.f32.mrb[36].mxu1 }
 0x1ef   : > { %v861_v23 = vadd.f32 %v860_v22, %v2211_v13  ;;  %v862_v24 = vpop.f32.mrb[37].mxu1 }
 0x1f0   : > { %v863_v25 = vadd.f32 %v862_v24, %v2213_v14  ;;  %v864_v26 = vpop.f32.mrb[38].mxu1  ;;  %1264 = vmatprep.mubr.bf16.mxu0 %v1042_v21 }
 0x1f1   : > { %v865_v27 = vadd.f32 %v864_v26, %v2211_v13  ;;  %v866_v28 = vpop.f32.mrb[39].mxu1  ;;  %1265 = vmatmul.mubr.bf16.gmra.mrb[32].mxu0 %v1041_v20  ;;  %v989_v30 = vmax.f32 %v861_v23, 0.0 }
 0x1f2   : > { %v867_v29 = vadd.f32 %v866_v28, %v2213_v14  ;;  %v990_v32 = vmax.f32 %v863_v25, 0.0 }
 0x1f3   : > { %v991_v31 = vmax.f32 %v865_v27, 0.0 }
 0x1f4   : > { %v992_v33 = vmax.f32 %v867_v29, 0.0 }
 0x1f5   : > { %v1043_v34 = vpack.c.bf16 %v991_v31, %v989_v30 }
 0x1f6   : > { %v1044_v35 = vpack.c.bf16 %v992_v33, %v990_v32  ;;  %v870_v36 = vpop.f32.mrb[40].mxu1 }
 0x1f7   : > { %v871_v37 = vadd.f32 %v870_v36, %v2211_v13  ;;  %v872_v38 = vpop.f32.mrb[41].mxu1 }
 0x1f8   : > { %v873_v39 = vadd.f32 %v872_v38, %v2213_v14  ;;  %v874_v40 = vpop.f32.mrb[42].mxu1  ;;  %1272 = vmatprep.mubr.bf16.mxu0 %v1044_v35 }
 0x1f9   : > { %v875_v41 = vadd.f32 %v874_v40, %v2211_v13  ;;  %v876_v42 = vpop.f32.mrb[43].mxu1  ;;  %1273 = vmatmul.mubr.bf16.gmra.mrb[36].mxu0 %v1043_v34  ;;  %v993_v44 = vmax.f32 %v871_v37, 0.0 }
 0x1fa   : > { %v877_v43 = vadd.f32 %v876_v42, %v2213_v14  ;;  %v994_v46 = vmax.f32 %v873_v39, 0.0 }
 0x1fb   : > { %v995_v45 = vmax.f32 %v875_v41, 0.0 }
 0x1fc   : > { %v996_v47 = vmax.f32 %v877_v43, 0.0 }
 0x1fd   : > { %v1045_v49 = vpack.c.bf16 %v995_v45, %v993_v44 }
 0x1fe   : > { %v1046_v51 = vpack.c.bf16 %v996_v47, %v994_v46  ;;  %v880_v52 = vpop.f32.mrb[44].mxu1 }
 0x1ff   : > { %v881_v53 = vadd.f32 %v880_v52, %v2211_v13  ;;  %v882_v54 = vpop.f32.mrb[45].mxu1 }
 0x200   : > { %v883_v55 = vadd.f32 %v882_v54, %v2213_v14  ;;  %v884_v56 = vpop.f32.mrb[46].mxu1  ;;  %1280 = vmatprep.mubr.bf16.mxu0 %v1046_v51 }
 0x201   : > { %v885_v58 = vadd.f32 %v884_v56, %v2211_v13  ;;  %v886_v59 = vpop.f32.mrb[47].mxu1  ;;  %1281 = vmatmul.mubr.bf16.gmra.mrb[40].mxu0 %v1045_v49  ;;  %v997_v61 = vmax.f32 %v881_v53, 0.0 }
 0x202   : > { %v887_v60 = vadd.f32 %v886_v59, %v2213_v14  ;;  %v998_v63 = vmax.f32 %v883_v55, 0.0 }
 0x203   : > { %v999_v62 = vmax.f32 %v885_v58, 0.0 }
 0x204   : > { %v1000_v0 = vmax.f32 %v887_v60, 0.0 }
 0x205   : > { %v1047_v1 = vpack.c.bf16 %v999_v62, %v997_v61 }
 0x206   : > { %v1048_v2 = vpack.c.bf16 %v1000_v0, %v998_v63  ;;  %v890_v5 = vpop.f32.mrb[48].mxu1 }
 0x207   : > { %v891_v6 = vadd.f32 %v890_v5, %v2211_v13  ;;  %v892_v7 = vpop.f32.mrb[49].mxu1 }
 0x208   : > { %v893_v4 = vadd.f32 %v892_v7, %v2213_v14  ;;  %v894_v57 = vpop.f32.mrb[50].mxu1  ;;  %1288 = vmatprep.mubr.bf16.mxu0 %v1048_v2 }
 0x209   : > { %v895_v48 = vadd.f32 %v894_v57, %v2211_v13  ;;  %v896_v50 = vpop.f32.mrb[51].mxu1  ;;  %1289 = vmatmul.mubr.bf16.gmra.mrb[44].mxu0 %v1047_v1  ;;  %v1001_v9 = vmax.f32 %v891_v6, 0.0 }
 0x20a   : > { %v897_v8 = vadd.f32 %v896_v50, %v2213_v14  ;;  %v1002_v11 = vmax.f32 %v893_v4, 0.0 }
 0x20b   : > { %v1003_v10 = vmax.f32 %v895_v48, 0.0 }
 0x20c   : > { %v1004_v12 = vmax.f32 %v897_v8, 0.0 }
 0x20d   : > { %v1049_v15 = vpack.c.bf16 %v1003_v10, %v1001_v9 }
 0x20e   : > { %v1050_v16 = vpack.c.bf16 %v1004_v12, %v1002_v11  ;;  %v900_v17 = vpop.f32.mrb[52].mxu1 }
 0x20f   : > { %v901_v18 = vadd.f32 %v900_v17, %v2211_v13  ;;  %v902_v3 = vpop.f32.mrb[53].mxu1 }
 0x210   : > { %v903_v19 = vadd.f32 %v902_v3, %v2213_v14  ;;  %v904_v20 = vpop.f32.mrb[54].mxu1  ;;  %1296 = vmatprep.mubr.bf16.mxu0 %v1050_v16 }
 0x211   : > { %v905_v21 = vadd.f32 %v904_v20, %v2211_v13  ;;  %v906_v22 = vpop.f32.mrb[55].mxu1  ;;  %1297 = vmatmul.mubr.bf16.gmra.mrb[48].mxu0 %v1049_v15  ;;  %v1005_v24 = vmax.f32 %v901_v18, 0.0 }
 0x212   : > { %v907_v23 = vadd.f32 %v906_v22, %v2213_v14  ;;  %v1006_v26 = vmax.f32 %v903_v19, 0.0 }
 0x213   : > { %v1007_v25 = vmax.f32 %v905_v21, 0.0 }
 0x214   : > { %v1008_v27 = vmax.f32 %v907_v23, 0.0 }
 0x215   : > { %v1051_v28 = vpack.c.bf16 %v1007_v25, %v1005_v24 }
 0x216   : > { %v1052_v29 = vpack.c.bf16 %v1008_v27, %v1006_v26  ;;  %v910_v30 = vpop.f32.mrb[56].mxu1 }
 0x217   : > { %v911_v31 = vadd.f32 %v910_v30, %v2211_v13  ;;  %v912_v32 = vpop.f32.mrb[57].mxu1 }
 0x218   : > { %v913_v33 = vadd.f32 %v912_v32, %v2213_v14  ;;  %v914_v34 = vpop.f32.mrb[58].mxu1  ;;  %1304 = vmatprep.mubr.bf16.mxu0 %v1052_v29 }
 0x219   : > { %v915_v35 = vadd.f32 %v914_v34, %v2211_v13  ;;  %v916_v36 = vpop.f32.mrb[59].mxu1  ;;  %1305 = vmatmul.mubr.bf16.gmra.mrb[52].mxu0 %v1051_v28  ;;  %v1009_v38 = vmax.f32 %v911_v31, 0.0 }
 0x21a   : > { %v917_v37 = vadd.f32 %v916_v36, %v2213_v14  ;;  %v1010_v40 = vmax.f32 %v913_v33, 0.0 }
 0x21b   : > { %v1011_v39 = vmax.f32 %v915_v35, 0.0 }
 0x21c   : > { %v1012_v41 = vmax.f32 %v917_v37, 0.0 }
 0x21d   : > { %v1053_v42 = vpack.c.bf16 %v1011_v39, %v1009_v38 }
 0x21e   : > { %v1054_v43 = vpack.c.bf16 %v1012_v41, %v1010_v40  ;;  %v920_v44 = vpop.f32.mrb[60].mxu1 }
 0x21f   : > { %v921_v45 = vadd.f32 %v920_v44, %v2211_v13  ;;  %v922_v46 = vpop.f32.mrb[61].mxu1 }
 0x220   : > { %v923_v47 = vadd.f32 %v922_v46, %v2213_v14  ;;  %v924_v49 = vpop.f32.mrb[62].mxu1  ;;  %1312 = vmatprep.mubr.bf16.mxu0 %v1054_v43 }
 0x221   : > { %v925_v51 = vadd.f32 %v924_v49, %v2211_v13  ;;  %v926_v52 = vpop.f32.mrb[63].mxu1  ;;  %1313 = vmatmul.mubr.bf16.gmra.mrb[56].mxu0 %v1053_v42  ;;  %v1013_v54 = vmax.f32 %v921_v45, 0.0 }
 0x222   : > { %v927_v53 = vadd.f32 %v926_v52, %v2213_v14  ;;  %v1014_v56 = vmax.f32 %v923_v47, 0.0 }
 0x223   : > { %v1015_v55 = vmax.f32 %v925_v51, 0.0 }
 0x224   : > { %v1016_v58 = vmax.f32 %v927_v53, 0.0 }
 0x225   : > { %v1055_v59 = vpack.c.bf16 %v1015_v55, %v1013_v54 }
 0x226   : > { %v1056_v60 = vpack.c.bf16 %v1016_v58, %v1014_v56  ;;  %v930_v61 = vpop.f32.mrb[64].mxu1  ;;  %v2282_v56 = vld [vmem:[%s2467_s6] ss:$0 sm:$0xff] }
 0x227   : > { %v931_v62 = vadd.f32 %v930_v61, %v2211_v13  ;;  %v932_v63 = vpop.f32.mrb[65].mxu1  ;;  %v2288_v61 = vld [vmem:[%s2468_s7] ss:$0 sm:$0xff] }
 0x228   : > { %v933_v0 = vadd.f32 %v932_v63, %v2213_v14  ;;  %v934_v1 = vpop.f32.mrb[66].mxu1  ;;  %1320 = vmatprep.mubr.bf16.mxu0 %v1056_v60 }
 0x229   : > { %v935_v2 = vadd.f32 %v934_v1, %v2211_v13  ;;  %v936_v5 = vpop.f32.mrb[67].mxu1  ;;  %1321 = vmatmul.mubr.bf16.gmra.mrb[60].mxu0 %v1055_v59  ;;  %v1017_v7 = vmax.f32 %v931_v62, 0.0 }
 0x22a   : > { %v937_v6 = vadd.f32 %v936_v5, %v2213_v14  ;;  %v1018_v57 = vmax.f32 %v933_v0, 0.0 }
 0x22b   : > { %v1019_v4 = vmax.f32 %v935_v2, 0.0 }
 0x22c   : > { %v1020_v48 = vmax.f32 %v937_v6, 0.0 }
 0x22d   : > { %v1057_v50 = vpack.c.bf16 %v1019_v4, %v1017_v7 }
 0x22e   : > { %v1058_v8 = vpack.c.bf16 %v1020_v48, %v1018_v57  ;;  %v940_v9 = vpop.f32.mrb[68].mxu1 }
 0x22f   : > { %v941_v10 = vadd.f32 %v940_v9, %v2211_v13  ;;  %v942_v11 = vpop.f32.mrb[69].mxu1 }
 0x230   : > { %v943_v12 = vadd.f32 %v942_v11, %v2213_v14  ;;  %v944_v15 = vpop.f32.mrb[70].mxu1  ;;  %1328 = vmatprep.mubr.bf16.mxu0 %v1058_v8 }
 0x231   : > { %v945_v16 = vadd.f32 %v944_v15, %v2211_v13  ;;  %v946_v17 = vpop.f32.mrb[71].mxu1  ;;  %1329 = vmatmul.mubr.bf16.gmra.mrb[64].mxu0 %v1057_v50  ;;  %v1021_v3 = vmax.f32 %v941_v10, 0.0 }
 0x232   : > { %v947_v18 = vadd.f32 %v946_v17, %v2213_v14  ;;  %v1022_v20 = vmax.f32 %v943_v12, 0.0 }
 0x233   : > { %v1023_v19 = vmax.f32 %v945_v16, 0.0 }
 0x234   : > { %v1024_v21 = vmax.f32 %v947_v18, 0.0 }
 0x235   : > { %v1059_v22 = vpack.c.bf16 %v1023_v19, %v1021_v3 }
 0x236   : > { %v1060_v23 = vpack.c.bf16 %v1024_v21, %v1022_v20  ;;  %v950_v24 = vpop.f32.mrb[72].mxu1 }
 0x237   : > { %v951_v25 = vadd.f32 %v950_v24, %v2211_v13  ;;  %v952_v26 = vpop.f32.mrb[73].mxu1 }
 0x238   : > { %v953_v27 = vadd.f32 %v952_v26, %v2213_v14  ;;  %v954_v28 = vpop.f32.mrb[74].mxu1  ;;  %1336 = vmatprep.mubr.bf16.mxu0 %v1060_v23 }
 0x239   : > { %v955_v29 = vadd.f32 %v954_v28, %v2211_v13  ;;  %v956_v30 = vpop.f32.mrb[75].mxu1  ;;  %1337 = vmatmul.mubr.bf16.gmra.mrb[68].mxu0 %v1059_v22  ;;  %v1025_v32 = vmax.f32 %v951_v25, 0.0 }
 0x23a   : > { %v957_v31 = vadd.f32 %v956_v30, %v2213_v14  ;;  %v1026_v34 = vmax.f32 %v953_v27, 0.0 }
 0x23b   : > { %v1027_v33 = vmax.f32 %v955_v29, 0.0 }
 0x23c   : > { %v1028_v35 = vmax.f32 %v957_v31, 0.0 }
 0x23d   : > { %v1061_v36 = vpack.c.bf16 %v1027_v33, %v1025_v32 }
 0x23e   : > { %v1062_v37 = vpack.c.bf16 %v1028_v35, %v1026_v34  ;;  %v960_v38 = vpop.f32.mrb[76].mxu1 }
 0x23f   : > { %v961_v39 = vadd.f32 %v960_v38, %v2211_v13  ;;  %v962_v40 = vpop.f32.mrb[77].mxu1 }
 0x240   : > { %v963_v41 = vadd.f32 %v962_v40, %v2213_v14  ;;  %v964_v42 = vpop.f32.mrb[78].mxu1  ;;  %1344 = vmatprep.mubr.bf16.mxu0 %v1062_v37 }
 0x241   : > { %v965_v43 = vadd.f32 %v964_v42, %v2211_v13  ;;  %v966_v44 = vpop.f32.mrb[79].mxu1  ;;  %1345 = vmatmul.mubr.bf16.gmra.mrb[72].mxu0 %v1061_v36  ;;  %v1029_v46 = vmax.f32 %v961_v39, 0.0 }
 0x242   : > { %v967_v45 = vadd.f32 %v966_v44, %v2213_v14  ;;  %v1030_v49 = vmax.f32 %v963_v41, 0.0 }
 0x243   : > { %v1031_v47 = vmax.f32 %v965_v43, 0.0 }
 0x244   : > { %v1032_v51 = vmax.f32 %v967_v45, 0.0 }
 0x245   : > { %v1063_v52 = vpack.c.bf16 %v1031_v47, %v1029_v46 }
 0x246   : > { %v1064_v53 = vpack.c.bf16 %v1032_v51, %v1030_v49 }
 0x248   : > { %1352 = vmatprep.mubr.bf16.mxu0 %v1064_v53 }
 0x249   : > { %1353 = vmatmul.mubr.bf16.gmra.mrb[76].mxu0 %v1063_v52 }
 0x2a4   : > { %v1723_v54 = vpop.f32.mrb[16].mxu0 }
 0x2a5   : > { %v1724_v55 = vpop.f32.mrb[17].mxu0 }
 0x2a6   : > { %v1725_v13 = vadd.f32 %v1724_v55, %v1723_v54  ;;  %v1726_v58 = vpop.f32.mrb[18].mxu0 }
 0x2a7   : > { %v1727_v59 = vpop.f32.mrb[19].mxu0 }
 0x2a8   : > { %v1728_v60 = vadd.f32 %v1727_v59, %v1726_v58  ;;  %v1235_v14 = vadd.f32 %v1725_v13, %v2282_v56 }
 0x2aa   : > { %v1238_v62 = vadd.f32 %v1728_v60, %v2282_v56  ;;  %v1361_v63 = vmax.f32 %v1235_v14, 0.0 }
 0x2ac   : > { %v1362_v0 = vmax.f32 %v1238_v62, 0.0  ;;  %v1729_v1 = vpop.f32.mrb[20].mxu0  ;;  %v1400_v2 = vmul.f32 %v2288_v61, %v1361_v63 }
 0x2ad   : > { %v1730_v5 = vpop.f32.mrb[21].mxu0 }
 0x2ae   : > { %v1731_v6 = vadd.f32 %v1730_v5, %v1729_v1  ;;  %v1732_v7 = vpop.f32.mrb[22].mxu0  ;;  %1432 = vadd.xlane.f32.xlu0 %v1400_v2  ;;  %v1401_v48 = vmul.f32 %v2288_v61, %v1362_v0 }
 0x2af   : > { %v1733_v4 = vpop.f32.mrb[23].mxu0 }
 0x2b0   : > { %v1734_v57 = vadd.f32 %v1733_v4, %v1732_v7  ;;  %v1243_v50 = vadd.f32 %v1731_v6, %v2282_v56 }
 0x2b2   : > { %v1246_v8 = vadd.f32 %v1734_v57, %v2282_v56  ;;  %1434 = vadd.xlane.f32.xlu0 %v1401_v48  ;;  %v1363_v9 = vmax.f32 %v1243_v50, 0.0 }
 0x2b4   : > { %v1364_v10 = vmax.f32 %v1246_v8, 0.0  ;;  %v1735_v11 = vpop.f32.mrb[24].mxu0  ;;  %v1402_v12 = vmul.f32 %v2288_v61, %v1363_v9 }
 0x2b5   : > { %v1736_v15 = vpop.f32.mrb[25].mxu0 }
 0x2b6   : > { %v1737_v16 = vadd.f32 %v1736_v15, %v1735_v11  ;;  %v1738_v17 = vpop.f32.mrb[26].mxu0  ;;  %1436 = vadd.xlane.f32.xlu1 %v1402_v12  ;;  %v1403_v20 = vmul.f32 %v2288_v61, %v1364_v10 }
 0x2b7   : > { %v1739_v18 = vpop.f32.mrb[27].mxu0 }
 0x2b8   : > { %v1251_v3 = vadd.f32 %v1737_v16, %v2282_v56  ;;  %v1740_v19 = vadd.f32 %v1739_v18, %v1738_v17 }
 0x2ba   : > { %v1365_v21 = vmax.f32 %v1251_v3, 0.0  ;;  %v1254_v22 = vadd.f32 %v1740_v19, %v2282_v56  ;;  %1438 = vadd.xlane.f32.xlu1 %v1403_v20 }
 0x2bc   : > { %v1366_v23 = vmax.f32 %v1254_v22, 0.0  ;;  %v1741_v24 = vpop.f32.mrb[28].mxu0  ;;  %v1404_v25 = vmul.f32 %v2288_v61, %v1365_v21 }
 0x2bd   : > { %v1742_v26 = vpop.f32.mrb[29].mxu0 }
 0x2be   : > { %v1743_v27 = vadd.f32 %v1742_v26, %v1741_v24  ;;  %v1744_v28 = vpop.f32.mrb[30].mxu0  ;;  %1440 = vadd.xlane.f32.xlu0 %v1404_v25  ;;  %v1405_v29 = vmul.f32 %v2288_v61, %v1366_v23 }
 0x2bf   : > { %v1745_v30 = vpop.f32.mrb[31].mxu0 }
 0x2c0   : > { %v1259_v31 = vadd.f32 %v1743_v27, %v2282_v56  ;;  %v1746_v32 = vadd.f32 %v1745_v30, %v1744_v28  ;;  %1442 = vadd.xlane.f32.xlu1 %v1405_v29 }
 0x2c2   : > { %v1367_v33 = vmax.f32 %v1259_v31, 0.0  ;;  %v1262_v34 = vadd.f32 %v1746_v32, %v2282_v56 }
 0x2c4   : > { %v1368_v35 = vmax.f32 %v1262_v34, 0.0  ;;  %v1747_v36 = vpop.f32.mrb[32].mxu0  ;;  %v1406_v37 = vmul.f32 %v2288_v61, %v1367_v33 }
 0x2c5   : > { %v1748_v38 = vpop.f32.mrb[33].mxu0 }
 0x2c6   : > { %v1749_v39 = vadd.f32 %v1748_v38, %v1747_v36  ;;  %v1750_v40 = vpop.f32.mrb[34].mxu0  ;;  %1444 = vadd.xlane.f32.xlu0 %v1406_v37  ;;  %v1407_v41 = vmul.f32 %v2288_v61, %v1368_v35 }
 0x2c7   : > { %v1751_v42 = vpop.f32.mrb[35].mxu0 }
 0x2c8   : > { %v1267_v43 = vadd.f32 %v1749_v39, %v2282_v56  ;;  %v1752_v44 = vadd.f32 %v1751_v42, %v1750_v40  ;;  %1446 = vadd.xlane.f32.xlu1 %v1407_v41 }
 0x2ca   : > { %v1369_v45 = vmax.f32 %v1267_v43, 0.0  ;;  %v1270_v46 = vadd.f32 %v1752_v44, %v2282_v56 }
 0x2cc   : > { %v1370_v47 = vmax.f32 %v1270_v46, 0.0  ;;  %v1753_v49 = vpop.f32.mrb[36].mxu0  ;;  %v1408_v51 = vmul.f32 %v2288_v61, %v1369_v45 }
 0x2cd   : > { %v1754_v52 = vpop.f32.mrb[37].mxu0 }
 0x2ce   : > { %v1755_v53 = vadd.f32 %v1754_v52, %v1753_v49  ;;  %v1756_v54 = vpop.f32.mrb[38].mxu0  ;;  %1448 = vadd.xlane.f32.xlu0 %v1408_v51  ;;  %v1409_v55 = vmul.f32 %v2288_v61, %v1370_v47 }
 0x2cf   : > { %v1757_v13 = vpop.f32.mrb[39].mxu0 }
 0x2d0   : > { %v1275_v58 = vadd.f32 %v1755_v53, %v2282_v56  ;;  %v1758_v59 = vadd.f32 %v1757_v13, %v1756_v54  ;;  %1450 = vadd.xlane.f32.xlu1 %v1409_v55 }
 0x2d2   : > { %v1371_v60 = vmax.f32 %v1275_v58, 0.0  ;;  %v1278_v14 = vadd.f32 %v1758_v59, %v2282_v56 }
 0x2d4   : > { %v1372_v62 = vmax.f32 %v1278_v14, 0.0  ;;  %v1759_v63 = vpop.f32.mrb[40].mxu0  ;;  %v1410_v0 = vmul.f32 %v2288_v61, %v1371_v60 }
 0x2d5   : > { %v1760_v1 = vpop.f32.mrb[41].mxu0 }
 0x2d6   : > { %v1761_v2 = vadd.f32 %v1760_v1, %v1759_v63  ;;  %v1762_v5 = vpop.f32.mrb[42].mxu0  ;;  %1452 = vadd.xlane.f32.xlu0 %v1410_v0  ;;  %v1411_v6 = vmul.f32 %v2288_v61, %v1372_v62 }
 0x2d7   : > { %v1763_v7 = vpop.f32.mrb[43].mxu0 }
 0x2d8   : > { %v1283_v4 = vadd.f32 %v1761_v2, %v2282_v56  ;;  %v1764_v57 = vadd.f32 %v1763_v7, %v1762_v5  ;;  %1454 = vadd.xlane.f32.xlu1 %v1411_v6 }
 0x2da   : > { %v1373_v48 = vmax.f32 %v1283_v4, 0.0  ;;  %v1286_v50 = vadd.f32 %v1764_v57, %v2282_v56 }
 0x2dc   : > { %v1374_v8 = vmax.f32 %v1286_v50, 0.0  ;;  %v1765_v9 = vpop.f32.mrb[44].mxu0  ;;  %v1412_v10 = vmul.f32 %v2288_v61, %v1373_v48 }
 0x2dd   : > { %v1766_v11 = vpop.f32.mrb[45].mxu0 }
 0x2de   : > { %v1767_v12 = vadd.f32 %v1766_v11, %v1765_v9  ;;  %v1768_v15 = vpop.f32.mrb[46].mxu0  ;;  %1456 = vadd.xlane.f32.xlu0 %v1412_v10  ;;  %v1413_v16 = vmul.f32 %v2288_v61, %v1374_v8 }
 0x2df   : > { %v1769_v17 = vpop.f32.mrb[47].mxu0 }
 0x2e0   : > { %v1291_v18 = vadd.f32 %v1767_v12, %v2282_v56  ;;  %v1770_v3 = vadd.f32 %v1769_v17, %v1768_v15  ;;  %1458 = vadd.xlane.f32.xlu1 %v1413_v16 }
 0x2e2   : > { %v1375_v19 = vmax.f32 %v1291_v18, 0.0  ;;  %v1294_v20 = vadd.f32 %v1770_v3, %v2282_v56 }
 0x2e4   : > { %v1376_v21 = vmax.f32 %v1294_v20, 0.0  ;;  %v1771_v22 = vpop.f32.mrb[48].mxu0  ;;  %v1414_v23 = vmul.f32 %v2288_v61, %v1375_v19 }
 0x2e5   : > { %v1772_v24 = vpop.f32.mrb[49].mxu0 }
 0x2e6   : > { %v1773_v25 = vadd.f32 %v1772_v24, %v1771_v22  ;;  %v1774_v26 = vpop.f32.mrb[50].mxu0  ;;  %1460 = vadd.xlane.f32.xlu0 %v1414_v23  ;;  %v1415_v27 = vmul.f32 %v2288_v61, %v1376_v21 }
 0x2e7   : > { %v1775_v28 = vpop.f32.mrb[51].mxu0 }
 0x2e8   : > { %v1299_v29 = vadd.f32 %v1773_v25, %v2282_v56  ;;  %v1776_v30 = vadd.f32 %v1775_v28, %v1774_v26  ;;  %1462 = vadd.xlane.f32.xlu1 %v1415_v27 }
 0x2ea   : > { %v1377_v31 = vmax.f32 %v1299_v29, 0.0  ;;  %v1302_v32 = vadd.f32 %v1776_v30, %v2282_v56 }
 0x2ec   : > { %v1378_v33 = vmax.f32 %v1302_v32, 0.0  ;;  %v1777_v34 = vpop.f32.mrb[52].mxu0  ;;  %v1416_v35 = vmul.f32 %v2288_v61, %v1377_v31 }
 0x2ed   : > { %v1778_v36 = vpop.f32.mrb[53].mxu0 }
 0x2ee   : > { %v1779_v37 = vadd.f32 %v1778_v36, %v1777_v34  ;;  %v1780_v38 = vpop.f32.mrb[54].mxu0  ;;  %1464 = vadd.xlane.f32.xlu0 %v1416_v35  ;;  %v1417_v39 = vmul.f32 %v2288_v61, %v1378_v33 }
 0x2ef   : > { %v1781_v40 = vpop.f32.mrb[55].mxu0 }
 0x2f0   : > { %v1307_v41 = vadd.f32 %v1779_v37, %v2282_v56  ;;  %v1782_v42 = vadd.f32 %v1781_v40, %v1780_v38  ;;  %1466 = vadd.xlane.f32.xlu1 %v1417_v39 }
 0x2f2   : > { %v1379_v43 = vmax.f32 %v1307_v41, 0.0  ;;  %v1310_v44 = vadd.f32 %v1782_v42, %v2282_v56 }
 0x2f4   : > { %v1380_v45 = vmax.f32 %v1310_v44, 0.0  ;;  %v1783_v46 = vpop.f32.mrb[56].mxu0  ;;  %v1418_v47 = vmul.f32 %v2288_v61, %v1379_v43 }
 0x2f5   : > { %v1784_v49 = vpop.f32.mrb[57].mxu0 }
 0x2f6   : > { %v1785_v51 = vadd.f32 %v1784_v49, %v1783_v46  ;;  %v1786_v52 = vpop.f32.mrb[58].mxu0  ;;  %1468 = vadd.xlane.f32.xlu0 %v1418_v47  ;;  %v1419_v53 = vmul.f32 %v2288_v61, %v1380_v45 }
 0x2f7   : > { %v1787_v54 = vpop.f32.mrb[59].mxu0 }
 0x2f8   : > { %v1315_v55 = vadd.f32 %v1785_v51, %v2282_v56  ;;  %v1788_v13 = vadd.f32 %v1787_v54, %v1786_v52  ;;  %1470 = vadd.xlane.f32.xlu1 %v1419_v53 }
 0x2fa   : > { %v1381_v58 = vmax.f32 %v1315_v55, 0.0  ;;  %v1318_v59 = vadd.f32 %v1788_v13, %v2282_v56 }
 0x2fc   : > { %v1382_v60 = vmax.f32 %v1318_v59, 0.0  ;;  %v1789_v14 = vpop.f32.mrb[60].mxu0  ;;  %v1420_v62 = vmul.f32 %v2288_v61, %v1381_v58 }
 0x2fd   : > { %v1790_v63 = vpop.f32.mrb[61].mxu0 }
 0x2fe   : > { %v1791_v0 = vadd.f32 %v1790_v63, %v1789_v14  ;;  %v1792_v1 = vpop.f32.mrb[62].mxu0  ;;  %1472 = vadd.xlane.f32.xlu0 %v1420_v62  ;;  %v1421_v2 = vmul.f32 %v2288_v61, %v1382_v60  ;;  %v2353_v14 = vld [vmem:[#allocation2] ss:$0 sm:$0xff] }
 0x2ff   : > { %v1793_v5 = vpop.f32.mrb[63].mxu0 }
 0x300   : > { %v1323_v6 = vadd.f32 %v1791_v0, %v2282_v56  ;;  %v1794_v7 = vadd.f32 %v1793_v5, %v1792_v1  ;;  %1474 = vadd.xlane.f32.xlu1 %v1421_v2 }
 0x302   : > { %v1383_v4 = vmax.f32 %v1323_v6, 0.0  ;;  %v1326_v57 = vadd.f32 %v1794_v7, %v2282_v56 }
 0x304   : > { %v1384_v48 = vmax.f32 %v1326_v57, 0.0  ;;  %v1795_v50 = vpop.f32.mrb[64].mxu0  ;;  %v1422_v8 = vmul.f32 %v2288_v61, %v1383_v4 }
 0x305   : > { %v1796_v9 = vpop.f32.mrb[65].mxu0 }
 0x306   : > { %v1797_v10 = vadd.f32 %v1796_v9, %v1795_v50  ;;  %v1798_v11 = vpop.f32.mrb[66].mxu0  ;;  %1476 = vadd.xlane.f32.xlu0 %v1422_v8  ;;  %v1423_v12 = vmul.f32 %v2288_v61, %v1384_v48 }
 0x307   : > { %v1799_v15 = vpop.f32.mrb[67].mxu0 }
 0x308   : > { %v1331_v16 = vadd.f32 %v1797_v10, %v2282_v56  ;;  %v1800_v17 = vadd.f32 %v1799_v15, %v1798_v11  ;;  %1478 = vadd.xlane.f32.xlu1 %v1423_v12 }
 0x30a   : > { %v1385_v18 = vmax.f32 %v1331_v16, 0.0  ;;  %v1334_v3 = vadd.f32 %v1800_v17, %v2282_v56 }
 0x30c   : > { %v1386_v19 = vmax.f32 %v1334_v3, 0.0  ;;  %v1801_v20 = vpop.f32.mrb[68].mxu0  ;;  %v1424_v21 = vmul.f32 %v2288_v61, %v1385_v18 }
 0x30d   : > { %v1802_v22 = vpop.f32.mrb[69].mxu0 }
 0x30e   : > { %v1803_v23 = vadd.f32 %v1802_v22, %v1801_v20  ;;  %v1804_v24 = vpop.f32.mrb[70].mxu0  ;;  %1480 = vadd.xlane.f32.xlu0 %v1424_v21  ;;  %v1425_v25 = vmul.f32 %v2288_v61, %v1386_v19 }
 0x30f   : > { %v1805_v26 = vpop.f32.mrb[71].mxu0 }
 0x310   : > { %v1339_v27 = vadd.f32 %v1803_v23, %v2282_v56  ;;  %v1806_v28 = vadd.f32 %v1805_v26, %v1804_v24  ;;  %1482 = vadd.xlane.f32.xlu1 %v1425_v25 }
 0x312   : > { %v1387_v29 = vmax.f32 %v1339_v27, 0.0  ;;  %v1342_v30 = vadd.f32 %v1806_v28, %v2282_v56 }
 0x314   : > { %v1388_v31 = vmax.f32 %v1342_v30, 0.0  ;;  %v1807_v32 = vpop.f32.mrb[72].mxu0  ;;  %v1426_v33 = vmul.f32 %v2288_v61, %v1387_v29 }
 0x315   : > { %v1808_v34 = vpop.f32.mrb[73].mxu0 }
 0x316   : > { %v1809_v35 = vadd.f32 %v1808_v34, %v1807_v32  ;;  %v1810_v36 = vpop.f32.mrb[74].mxu0  ;;  %1484 = vadd.xlane.f32.xlu0 %v1426_v33  ;;  %v1427_v37 = vmul.f32 %v2288_v61, %v1388_v31 }
 0x317   : > { %v1811_v38 = vpop.f32.mrb[75].mxu0 }
 0x318   : > { %v1347_v39 = vadd.f32 %v1809_v35, %v2282_v56  ;;  %v1812_v40 = vadd.f32 %v1811_v38, %v1810_v36  ;;  %1486 = vadd.xlane.f32.xlu1 %v1427_v37 }
 0x31a   : > { %v1389_v41 = vmax.f32 %v1347_v39, 0.0  ;;  %v1350_v42 = vadd.f32 %v1812_v40, %v2282_v56 }
 0x31c   : > { %v1390_v43 = vmax.f32 %v1350_v42, 0.0  ;;  %v1813_v44 = vpop.f32.mrb[76].mxu0  ;;  %v1428_v45 = vmul.f32 %v2288_v61, %v1389_v41 }
 0x31d   : > { %v1814_v46 = vpop.f32.mrb[77].mxu0 }
 0x31e   : > { %v1815_v47 = vadd.f32 %v1814_v46, %v1813_v44  ;;  %v1816_v49 = vpop.f32.mrb[78].mxu0  ;;  %1488 = vadd.xlane.f32.xlu0 %v1428_v45  ;;  %v1429_v51 = vmul.f32 %v2288_v61, %v1390_v43 }
 0x31f   : > { %v1817_v52 = vpop.f32.mrb[79].mxu0 }
 0x320   : > { %v1355_v53 = vadd.f32 %v1815_v47, %v2282_v56  ;;  %v1818_v54 = vadd.f32 %v1817_v52, %v1816_v49  ;;  %1490 = vadd.xlane.f32.xlu1 %v1429_v51 }
 0x322   : > { %v1391_v55 = vmax.f32 %v1355_v53, 0.0  ;;  %v1358_v13 = vadd.f32 %v1818_v54, %v2282_v56 }
 0x324   : > { %v1392_v58 = vmax.f32 %v1358_v13, 0.0  ;;  %v1430_v59 = vmul.f32 %v2288_v61, %v1391_v55 }
 0x326   : > { %1492 = vadd.xlane.f32.xlu0 %v1430_v59  ;;  %v1431_v60 = vmul.f32 %v2288_v61, %v1392_v58 }
 0x328   : > { %1494 = vadd.xlane.f32.xlu1 %v1431_v60 }
 0x33b   : > { %v1433_v56 = vpop.xlane.xlu0 %1432 }
 0x33c   : > { %v1503_v62 = vadd.f32 %v2353_v14, %v1433_v56 }
 0x33e   : > { %1536 = vst.msk [vmem:[%s2360_s18] sm:$0xff] %vm1535_vm1, %v1503_v62 }
 0x33f   : > { %v1435_v61 = vpop.xlane.xlu0 %1434 }
 0x340   : > { %v1504_v63 = vadd.f32 %v2353_v14, %v1435_v61 }
 0x342   : > { %1537 = vst.msk [vmem:[%s2360_s18 + $0x8] sm:$0xff] %vm1535_vm1, %v1504_v63 }
 0x343   : > { %v1437_v0 = vpop.xlane.xlu1 %1436 }
 0x344   : > { %v1505_v1 = vadd.f32 %v2353_v14, %v1437_v0 }
 0x346   : > { %1538 = vst.msk [vmem:[%s2360_s18 + $0x10] sm:$0xff] %vm1535_vm1, %v1505_v1 }
 0x347   : > { %v1439_v2 = vpop.xlane.xlu1 %1438 }
 0x348   : > { %v1506_v5 = vadd.f32 %v2353_v14, %v1439_v2 }
 0x34a   : > { %1539 = vst.msk [vmem:[%s2360_s18 + $0x18] sm:$0xff] %vm1535_vm1, %v1506_v5 }
 0x34b   : > { %v1441_v6 = vpop.xlane.xlu0 %1440 }
 0x34c   : > { %v1507_v7 = vadd.f32 %v2353_v14, %v1441_v6 }
 0x34d   : > { %v1443_v4 = vpop.xlane.xlu1 %1442 }
 0x34e   : > { %1540 = vst.msk [vmem:[%s2360_s18 + $0x20] sm:$0xff] %vm1535_vm1, %v1507_v7  ;;  %v1508_v57 = vadd.f32 %v2353_v14, %v1443_v4 }
 0x350   : > { %1541 = vst.msk [vmem:[%s2360_s18 + $0x28] sm:$0xff] %vm1535_vm1, %v1508_v57 }
 0x353   : > { %v1445_v48 = vpop.xlane.xlu0 %1444 }
 0x354   : > { %v1509_v50 = vadd.f32 %v2353_v14, %v1445_v48 }
 0x355   : > { %v1447_v8 = vpop.xlane.xlu1 %1446 }
 0x356   : > { %1542 = vst.msk [vmem:[%s2360_s18 + $0x30] sm:$0xff] %vm1535_vm1, %v1509_v50  ;;  %v1510_v9 = vadd.f32 %v2353_v14, %v1447_v8 }
 0x358   : > { %1543 = vst.msk [vmem:[%s2360_s18 + $0x38] sm:$0xff] %vm1535_vm1, %v1510_v9 }
 0x35b   : > { %v1449_v10 = vpop.xlane.xlu0 %1448 }
 0x35c   : > { %v1511_v11 = vadd.f32 %v2353_v14, %v1449_v10 }
 0x35d   : > { %v1451_v12 = vpop.xlane.xlu1 %1450 }
 0x35e   : > { %1544 = vst.msk [vmem:[%s2360_s18 + $0x40] sm:$0xff] %vm1535_vm1, %v1511_v11  ;;  %v1512_v15 = vadd.f32 %v2353_v14, %v1451_v12 }
 0x360   : > { %1545 = vst.msk [vmem:[%s2360_s18 + $0x48] sm:$0xff] %vm1535_vm1, %v1512_v15 }
 0x363   : > { %v1453_v16 = vpop.xlane.xlu0 %1452 }
 0x364   : > { %v1513_v17 = vadd.f32 %v2353_v14, %v1453_v16 }
 0x365   : > { %v1455_v18 = vpop.xlane.xlu1 %1454 }
 0x366   : > { %1546 = vst.msk [vmem:[%s2360_s18 + $0x50] sm:$0xff] %vm1535_vm1, %v1513_v17  ;;  %v1514_v3 = vadd.f32 %v2353_v14, %v1455_v18 }
 0x368   : > { %1547 = vst.msk [vmem:[%s2360_s18 + $0x58] sm:$0xff] %vm1535_vm1, %v1514_v3 }
 0x36b   : > { %v1457_v19 = vpop.xlane.xlu0 %1456 }
 0x36c   : > { %v1515_v20 = vadd.f32 %v2353_v14, %v1457_v19 }
 0x36d   : > { %v1459_v21 = vpop.xlane.xlu1 %1458 }
 0x36e   : > { %1548 = vst.msk [vmem:[%s2360_s18 + $0x60] sm:$0xff] %vm1535_vm1, %v1515_v20  ;;  %v1516_v22 = vadd.f32 %v2353_v14, %v1459_v21 }
 0x370   : > { %1549 = vst.msk [vmem:[%s2360_s18 + $0x68] sm:$0xff] %vm1535_vm1, %v1516_v22 }
 0x373   : > { %v1461_v23 = vpop.xlane.xlu0 %1460 }
 0x374   : > { %v1517_v24 = vadd.f32 %v2353_v14, %v1461_v23 }
 0x375   : > { %v1463_v25 = vpop.xlane.xlu1 %1462 }
 0x376   : > { %1550 = vst.msk [vmem:[%s2360_s18 + $0x70] sm:$0xff] %vm1535_vm1, %v1517_v24  ;;  %v1518_v26 = vadd.f32 %v2353_v14, %v1463_v25 }
 0x378   : > { %1551 = vst.msk [vmem:[%s2360_s18 + $0x78] sm:$0xff] %vm1535_vm1, %v1518_v26 }
 0x37b   : > { %v1465_v27 = vpop.xlane.xlu0 %1464 }
 0x37c   : > { %v1519_v28 = vadd.f32 %v2353_v14, %v1465_v27 }
 0x37d   : > { %v1467_v29 = vpop.xlane.xlu1 %1466 }
 0x37e   : > { %1552 = vst.msk [vmem:[%s2360_s18 + $0x80] sm:$0xff] %vm1535_vm1, %v1519_v28  ;;  %v1520_v30 = vadd.f32 %v2353_v14, %v1467_v29 }
 0x380   : > { %1553 = vst.msk [vmem:[%s2360_s18 + $0x88] sm:$0xff] %vm1535_vm1, %v1520_v30 }
 0x383   : > { %v1469_v31 = vpop.xlane.xlu0 %1468 }
 0x384   : > { %v1521_v32 = vadd.f32 %v2353_v14, %v1469_v31 }
 0x385   : > { %v1471_v33 = vpop.xlane.xlu1 %1470 }
 0x386   : > { %1554 = vst.msk [vmem:[%s2360_s18 + $0x90] sm:$0xff] %vm1535_vm1, %v1521_v32  ;;  %v1522_v34 = vadd.f32 %v2353_v14, %v1471_v33 }
 0x388   : > { %1555 = vst.msk [vmem:[%s2360_s18 + $0x98] sm:$0xff] %vm1535_vm1, %v1522_v34 }
 0x38b   : > { %v1473_v35 = vpop.xlane.xlu0 %1472 }
 0x38c   : > { %v1523_v36 = vadd.f32 %v2353_v14, %v1473_v35 }
 0x38d   : > { %v1475_v37 = vpop.xlane.xlu1 %1474 }
 0x38e   : > { %1556 = vst.msk [vmem:[%s2360_s18 + $0xa0] sm:$0xff] %vm1535_vm1, %v1523_v36  ;;  %v1524_v38 = vadd.f32 %v2353_v14, %v1475_v37 }
 0x390   : > { %1557 = vst.msk [vmem:[%s2360_s18 + $0xa8] sm:$0xff] %vm1535_vm1, %v1524_v38 }
 0x393   : > { %v1477_v39 = vpop.xlane.xlu0 %1476 }
 0x394   : > { %v1525_v40 = vadd.f32 %v2353_v14, %v1477_v39 }
 0x395   : > { %v1479_v41 = vpop.xlane.xlu1 %1478 }
 0x396   : > { %1558 = vst.msk [vmem:[%s2360_s18 + $0xb0] sm:$0xff] %vm1535_vm1, %v1525_v40  ;;  %v1526_v42 = vadd.f32 %v2353_v14, %v1479_v41 }
 0x398   : > { %1559 = vst.msk [vmem:[%s2360_s18 + $0xb8] sm:$0xff] %vm1535_vm1, %v1526_v42 }
 0x39b   : > { %v1481_v43 = vpop.xlane.xlu0 %1480 }
 0x39c   : > { %v1527_v44 = vadd.f32 %v2353_v14, %v1481_v43 }
 0x39d   : > { %v1483_v45 = vpop.xlane.xlu1 %1482 }
 0x39e   : > { %1560 = vst.msk [vmem:[%s2360_s18 + $0xc0] sm:$0xff] %vm1535_vm1, %v1527_v44  ;;  %v1528_v46 = vadd.f32 %v2353_v14, %v1483_v45 }
 0x3a0   : > { %1561 = vst.msk [vmem:[%s2360_s18 + $0xc8] sm:$0xff] %vm1535_vm1, %v1528_v46 }
 0x3a3   : > { %v1485_v47 = vpop.xlane.xlu0 %1484 }
 0x3a4   : > { %v1529_v49 = vadd.f32 %v2353_v14, %v1485_v47 }
 0x3a5   : > { %v1487_v51 = vpop.xlane.xlu1 %1486 }
 0x3a6   : > { %1562 = vst.msk [vmem:[%s2360_s18 + $0xd0] sm:$0xff] %vm1535_vm1, %v1529_v49  ;;  %v1530_v52 = vadd.f32 %v2353_v14, %v1487_v51 }
 0x3a8   : > { %1563 = vst.msk [vmem:[%s2360_s18 + $0xd8] sm:$0xff] %vm1535_vm1, %v1530_v52 }
 0x3ab   : > { %v1489_v53 = vpop.xlane.xlu0 %1488 }
 0x3ac   : > { %v1531_v54 = vadd.f32 %v2353_v14, %v1489_v53 }
 0x3ad   : > { %v1491_v55 = vpop.xlane.xlu1 %1490 }
 0x3ae   : > { %1564 = vst.msk [vmem:[%s2360_s18 + $0xe0] sm:$0xff] %vm1535_vm1, %v1531_v54  ;;  %v1532_v13 = vadd.f32 %v2353_v14, %v1491_v55 }
 0x3b0   : > { %1565 = vst.msk [vmem:[%s2360_s18 + $0xe8] sm:$0xff] %vm1535_vm1, %v1532_v13 }
 0x3b3   : > { %v1493_v58 = vpop.xlane.xlu0 %1492 }
 0x3b4   : > { %v1533_v59 = vadd.f32 %v2353_v14, %v1493_v58 }
 0x3b5   : > { %v1495_v60 = vpop.xlane.xlu1 %1494 }
 0x3b6   : > { %1566 = vst.msk [vmem:[%s2360_s18 + $0xf0] sm:$0xff] %vm1535_vm1, %v1533_v59  ;;  %v1534_v56 = vadd.f32 %v2353_v14, %v1495_v60 }
 0x3b8   : > { %1567 = vst.msk [vmem:[%s2360_s18 + $0xf8] sm:$0xff] %vm1535_vm1, %v1534_v56 }
 0x3b9 PF: > { %s21_s11 = sadd.s32 1, %s1916_s11  }
 0x3ba   : > { %p18_p4 = scmp.ge.s32.totalorder %s21_s11, 4  }
 0x3bc   :  { %20 = sbr.rel (!%p18_p4) target bundleno = 3 (0x3), region = 86 }

</bundles_post_ra>
